<compile_context>
chip_gen: v7x
topology: tpu7x:2x2x1
jax: 0.10.0
libtpu: 0.0.40
codegen_flags: <defaults>
</compile_context>

<pallas_src>
import functools

import jax
import jax.numpy as jnp
from jax.experimental import pallas as pl
from jax.experimental.pallas import tpu as pltpu


def _pick_l_tile(L, row_bytes, budget_bytes):
    """Largest L-tile that divides L, is lane-aligned (multiple of 128 or == L),
    and keeps one (B, C, tile_L) f32-equivalent block under `budget_bytes`.
    Falls back to the smallest legal tile if nothing fits."""
    cands = [d for d in range(L, 0, -1) if L % d == 0 and (d % 128 == 0 or d == L)]
    for d in cands:  # descending
        if d * row_bytes <= budget_bytes:
            return d
    return cands[-1]


# ----------------------------------------------------------------------------
# Fused path: whole x resident in VMEM -> 1 HBM read + 1 HBM write of x.
# ----------------------------------------------------------------------------
def _fused_kernel(x_ref, w1t_ref, b1_ref, w2t_ref, b2_ref, o_ref, *, inv_l):
    x = x_ref[...].astype(jnp.float32)                               # (B, C, L)
    y = jnp.sum(x, axis=-1) * inv_l                                  # (B, C)
    h = jnp.dot(y, w1t_ref[...], preferred_element_type=jnp.float32)
    h = jnp.maximum(h + b1_ref[...], 0.0)                            # (B, H)
    z = jnp.dot(h, w2t_ref[...], preferred_element_type=jnp.float32)
    s = jax.nn.sigmoid(z + b2_ref[...])                              # (B, C)
    o_ref[...] = (x * s[:, :, None]).astype(o_ref.dtype)


# ----------------------------------------------------------------------------
# Tiled pass 1: squeeze (mean over L) + excite (fc1 -> relu -> fc2 -> sigmoid).
# x block (B, C, tile_L); grid over L-tiles (reduction axis, "arbitrary").
# Per-step: pure VPU accumulate; final step: one XLU lane-reduce + tiny FCs.
# ----------------------------------------------------------------------------
def _squeeze_excite_kernel(x_ref, w1t_ref, b1_ref, w2t_ref, b2_ref,
                           s_ref, acc_ref, *, inv_l):
    l = pl.program_id(0)

    @pl.when(l == 0)
    def _():
        acc_ref[...] = jnp.zeros_like(acc_ref)

    # Lane-dense elementwise accumulate (no per-step cross-lane work).
    acc_ref[...] += x_ref[...].astype(jnp.float32)                   # (B, C, tl)

    @pl.when(l == pl.num_programs(0) - 1)
    def _():
        y = jnp.sum(acc_ref[...], axis=-1) * inv_l                   # (B, C)
        h = jnp.dot(y, w1t_ref[...], preferred_element_type=jnp.float32)
        h = jnp.maximum(h + b1_ref[...], 0.0)                        # (B, H)
        z = jnp.dot(h, w2t_ref[...], preferred_element_type=jnp.float32)
        s_ref[...] = jax.nn.sigmoid(z + b2_ref[...]).astype(s_ref.dtype)


# ----------------------------------------------------------------------------
# Tiled pass 2: scale.  x block (B, C, tile_L); gate block (B, C, 1)
# broadcasts along lanes (the L axis).  Pure lane-dense multiply + store.
# ----------------------------------------------------------------------------
def _scale_kernel(x_ref, s_ref, o_ref):
    o_ref[...] = (x_ref[...].astype(jnp.float32) * s_ref[...]).astype(o_ref.dtype)


def squeeze_excite(x, w1, b1, w2, b2, *,
                   block_bytes=2 << 20,           # per x-block f32 VMEM budget
                   fuse_threshold_bytes=4 << 20,  # fused path if f32(x) fits
                   vmem_limit_bytes=32 << 20):    # headroom vs v7x 64 MiB VMEM
    B, C, L = x.shape
    H = w1.shape[0]

    # Wrapper-side weight plumbing (tiny arrays): pre-transpose + cast to f32
    # so there is no in-kernel .T (XLU) or per-step dtype conversion.
    w1t = jnp.transpose(w1).astype(jnp.float32)   # (C, H)
    w2t = jnp.transpose(w2).astype(jnp.float32)   # (H, C)
    b1r = b1.reshape(1, H).astype(jnp.float32)
    b2r = b2.reshape(1, C).astype(jnp.float32)

    compiler_kwargs = dict(vmem_limit_bytes=vmem_limit_bytes)

    # ---- fused fast path: x fits in VMEM -> single kernel, 1R + 1W ---------
    if B * C * L * 4 <= fuse_threshold_bytes:
        return pl.pallas_call(
            functools.partial(_fused_kernel, inv_l=1.0 / L),
            out_shape=jax.ShapeDtypeStruct((B, C, L), x.dtype),
            grid_spec=pltpu.PrefetchScalarGridSpec(
                num_scalar_prefetch=0,
                grid=(1,),
                in_specs=[
                    pl.BlockSpec((B, C, L), lambda i: (0, 0, 0)),
                    pl.BlockSpec((C, H), lambda i: (0, 0)),
                    pl.BlockSpec((1, H), lambda i: (0, 0)),
                    pl.BlockSpec((H, C), lambda i: (0, 0)),
                    pl.BlockSpec((1, C), lambda i: (0, 0)),
                ],
                out_specs=pl.BlockSpec((B, C, L), lambda i: (0, 0, 0)),
            ),
            compiler_params=pltpu.CompilerParams(
                dimension_semantics=("arbitrary",), **compiler_kwargs),
        )(x, w1t, b1r, w2t, b2r)

    # ---- tiled two-pass path (x too big for VMEM): 2R + 1W ------------------
    # Budget the f32-equivalent block (the accumulator is f32).
    row_bytes = B * C * max(jnp.dtype(x.dtype).itemsize, 4)
    tl = _pick_l_tile(L, row_bytes, block_bytes)

    # pass 1: per-(B, C) gate s
    s = pl.pallas_call(
        functools.partial(_squeeze_excite_kernel, inv_l=1.0 / L),
        out_shape=jax.ShapeDtypeStruct((B, C), jnp.float32),
        grid_spec=pltpu.PrefetchScalarGridSpec(
            num_scalar_prefetch=0,
            grid=(L // tl,),
            in_specs=[
                pl.BlockSpec((B, C, tl), lambda l: (0, 0, l)),
                pl.BlockSpec((C, H), lambda l: (0, 0)),
                pl.BlockSpec((1, H), lambda l: (0, 0)),
                pl.BlockSpec((H, C), lambda l: (0, 0)),
                pl.BlockSpec((1, C), lambda l: (0, 0)),
            ],
            out_specs=pl.BlockSpec((B, C), lambda l: (0, 0)),
            scratch_shapes=[pltpu.VMEM((B, C, tl), jnp.float32)],
        ),
        compiler_params=pltpu.CompilerParams(
            dimension_semantics=("arbitrary",), **compiler_kwargs),
    )(x, w1t, b1r, w2t, b2r)

    # pass 2: lane-dense broadcast multiply
    s3 = s.reshape(B, C, 1)
    return pl.pallas_call(
        _scale_kernel,
        out_shape=jax.ShapeDtypeStruct((B, C, L), x.dtype),
        grid_spec=pltpu.PrefetchScalarGridSpec(
            num_scalar_prefetch=0,
            grid=(L // tl,),
            in_specs=[
                pl.BlockSpec((B, C, tl), lambda l: (0, 0, l)),
                pl.BlockSpec((B, C, 1), lambda l: (0, 0, 0)),
            ],
            out_specs=pl.BlockSpec((B, C, tl), lambda l: (0, 0, l)),
        ),
        compiler_params=pltpu.CompilerParams(
            dimension_semantics=("parallel",), **compiler_kwargs),
    )(x, s3)


def reference(x, w1, b1, w2, b2):
    y = jnp.mean(x, axis=-1)
    h = jax.nn.relu(y @ w1.T + b1)
    s = jax.nn.sigmoid(h @ w2.T + b2)
    return x * s[:, :, None]


if __name__ == "__main__":
    key = jax.random.PRNGKey(0)
    B, C, L = 4, 128, 256
    reduction_ratio = 16
    H = C // reduction_ratio  # 8

    kx, k1, k2, k3, k4 = jax.random.split(key, 5)
    x = jax.random.normal(kx, (B, C, L), dtype=jnp.float32)
    # deterministic fan-in uniform init (like nn.Linear default)
    w1 = jax.random.uniform(k1, (H, C), jnp.float32, -1.0, 1.0) / jnp.sqrt(C)
    b1 = jax.random.uniform(k2, (H,), jnp.float32, -1.0, 1.0) / jnp.sqrt(C)
    w2 = jax.random.uniform(k3, (C, H), jnp.float32, -1.0, 1.0) / jnp.sqrt(H)
    b2 = jax.random.uniform(k4, (C,), jnp.float32, -1.0, 1.0) / jnp.sqrt(H)

    ref = reference(x, w1, b1, w2, b2)

    # Path 1: fused single-block kernel (whole x fits in VMEM at this size).
    out_fused = jax.block_until_ready(squeeze_excite(x, w1, b1, w2, b2))
    assert jnp.allclose(out_fused, ref, atol=1e-5, rtol=1e-5), "fused mismatch"

    # Path 2: tiled two-pass kernels, forced with a tiny block budget so the
    # multi-step accumulator grid and the tiled scale pass are exercised.
    out_tiled = jax.block_until_ready(
        squeeze_excite(x, w1, b1, w2, b2,
                       fuse_threshold_bytes=0, block_bytes=64 * 1024))
    assert jnp.allclose(out_tiled, ref, atol=1e-5, rtol=1e-5), "tiled mismatch"

    print("KERNEL_OK")
</pallas_src>

<mosaic_0001>
module attributes {stable_mosaic.version = 11 : i64} {
  func.func @_fused_kernel(%arg0: i32, %arg1: memref<4x128x256xf32, #tpu.memory_space<vmem>>, %arg2: memref<128x8xf32, #tpu.memory_space<vmem>>, %arg3: memref<1x8xf32, #tpu.memory_space<vmem>>, %arg4: memref<8x128xf32, #tpu.memory_space<vmem>>, %arg5: memref<1x128xf32, #tpu.memory_space<vmem>>, %arg6: memref<4x128x256xf32, #tpu.memory_space<vmem>>) attributes {dimension_semantics = [#tpu.dimension_semantics<arbitrary>], iteration_bounds = array<i64: 1>, scalar_prefetch = 0 : i64, scratch_operands = 0 : i64, tpu.core_type = #tpu.core_type<tc>, window_params = [{pipeline_mode = #tpu.pipeline_mode<synchronous>, transform_indices = @transform_0, window_bounds = array<i64: 4, 128, 256>}, {pipeline_mode = #tpu.pipeline_mode<synchronous>, transform_indices = @transform_1, window_bounds = array<i64: 128, 8>}, {pipeline_mode = #tpu.pipeline_mode<synchronous>, transform_indices = @transform_2, window_bounds = array<i64: 1, 8>}, {pipeline_mode = #tpu.pipeline_mode<synchronous>, transform_indices = @transform_3, window_bounds = array<i64: 8, 128>}, {pipeline_mode = #tpu.pipeline_mode<synchronous>, transform_indices = @transform_4, window_bounds = array<i64: 1, 128>}, {pipeline_mode = #tpu.pipeline_mode<synchronous>, transform_indices = @transform_5, window_bounds = array<i64: 4, 128, 256>}]} {
    %c0 = arith.constant 0 : index
    %c0_0 = arith.constant 0 : index
    %c0_1 = arith.constant 0 : index
    %0 = vector.load %arg1[%c0, %c0_0, %c0_1] : memref<4x128x256xf32, #tpu.memory_space<vmem>>, vector<4x128x256xf32>
    %cst = arith.constant dense<0.000000e+00> : vector<4x128xf32>
    %1 = vector.multi_reduction <add>, %0, %cst [2] : vector<4x128x256xf32> to vector<4x128xf32>
    %cst_2 = arith.constant 3.906250e-03 : f32
    %2 = vector.broadcast %cst_2 : f32 to vector<4x128xf32>
    %3 = arith.mulf %1, %2 : vector<4x128xf32>
    %c0_3 = arith.constant 0 : index
    %c0_4 = arith.constant 0 : index
    %4 = vector.load %arg2[%c0_3, %c0_4] : memref<128x8xf32, #tpu.memory_space<vmem>>, vector<128x8xf32>
    %cst_5 = arith.constant dense<0.000000e+00> : vector<4x8xf32>
    %5 = tpu.matmul %3, %4, %cst_5 {dimension_numbers = #tpu.dot_dimension_numbers<[1], [0], [0], [1], [0, 0, 1, 1], [], []>} : vector<4x128xf32>, vector<128x8xf32>, vector<4x8xf32> -> vector<4x8xf32>
    %c0_6 = arith.constant 0 : index
    %c0_7 = arith.constant 0 : index
    %6 = vector.load %arg3[%c0_6, %c0_7] : memref<1x8xf32, #tpu.memory_space<vmem>>, vector<1x8xf32>
    %7 = vector.broadcast %6 : vector<1x8xf32> to vector<4x8xf32>
    %8 = arith.addf %5, %7 : vector<4x8xf32>
    %cst_8 = arith.constant 0.000000e+00 : f32
    %9 = vector.broadcast %cst_8 : f32 to vector<4x8xf32>
    %10 = arith.maximumf %8, %9 : vector<4x8xf32>
    %c0_9 = arith.constant 0 : index
    %c0_10 = arith.constant 0 : index
    %11 = vector.load %arg4[%c0_9, %c0_10] : memref<8x128xf32, #tpu.memory_space<vmem>>, vector<8x128xf32>
    %cst_11 = arith.constant dense<0.000000e+00> : vector<4x128xf32>
    %12 = tpu.matmul %10, %11, %cst_11 {dimension_numbers = #tpu.dot_dimension_numbers<[1], [0], [0], [1], [0, 0, 1, 1], [], []>} : vector<4x8xf32>, vector<8x128xf32>, vector<4x128xf32> -> vector<4x128xf32>
    %c0_12 = arith.constant 0 : index
    %c0_13 = arith.constant 0 : index
    %13 = vector.load %arg5[%c0_12, %c0_13] : memref<1x128xf32, #tpu.memory_space<vmem>>, vector<1x128xf32>
    %14 = vector.broadcast %13 : vector<1x128xf32> to vector<4x128xf32>
    %15 = arith.addf %12, %14 : vector<4x128xf32>
    %16 = arith.negf %15 : vector<4x128xf32>
    %17 = math.exp %16 : vector<4x128xf32>
    %cst_14 = arith.constant 1.000000e+00 : f32
    %18 = vector.broadcast %cst_14 : f32 to vector<4x128xf32>
    %19 = arith.addf %18, %17 : vector<4x128xf32>
    %20 = arith.divf %18, %19 : vector<4x128xf32>
    %21 = vector.shape_cast %20 : vector<4x128xf32> to vector<4x128x1xf32>
    %22 = vector.broadcast %21 : vector<4x128x1xf32> to vector<4x128x256xf32>
    %23 = arith.mulf %0, %22 : vector<4x128x256xf32>
    %c0_15 = arith.constant 0 : index
    %c0_16 = arith.constant 0 : index
    %c0_17 = arith.constant 0 : index
    %24 = vector.load %arg6[%c0_15, %c0_16, %c0_17] : memref<4x128x256xf32, #tpu.memory_space<vmem>>, vector<4x128x256xf32>
    tpu.vector_store %arg6[%c0_15, %c0_16, %c0_17], %23 {strides = array<i32>} : memref<4x128x256xf32, #tpu.memory_space<vmem>>, vector<4x128x256xf32>,
    return
  }
  func.func @transform_0(%arg0: i32) -> (i32, i32, i32) {
    %c0_i32 = arith.constant 0 : i32
    %c0_i32_0 = arith.constant 0 : i32
    %c0_i32_1 = arith.constant 0 : i32
    %c0_i32_2 = arith.constant 0 : i32
    return %c0_i32, %c0_i32_0, %c0_i32_1 : i32, i32, i32
  }
  func.func @transform_1(%arg0: i32) -> (i32, i32) {
    %c0_i32 = arith.constant 0 : i32
    %c0_i32_0 = arith.constant 0 : i32
    %c0_i32_1 = arith.constant 0 : i32
    return %c0_i32, %c0_i32_0 : i32, i32
  }
  func.func @transform_2(%arg0: i32) -> (i32, i32) {
    %c0_i32 = arith.constant 0 : i32
    %c0_i32_0 = arith.constant 0 : i32
    %c0_i32_1 = arith.constant 0 : i32
    return %c0_i32, %c0_i32_0 : i32, i32
  }
  func.func @transform_3(%arg0: i32) -> (i32, i32) {
    %c0_i32 = arith.constant 0 : i32
    %c0_i32_0 = arith.constant 0 : i32
    %c0_i32_1 = arith.constant 0 : i32
    return %c0_i32, %c0_i32_0 : i32, i32
  }
  func.func @transform_4(%arg0: i32) -> (i32, i32) {
    %c0_i32 = arith.constant 0 : i32
    %c0_i32_0 = arith.constant 0 : i32
    %c0_i32_1 = arith.constant 0 : i32
    return %c0_i32, %c0_i32_0 : i32, i32
  }
  func.func @transform_5(%arg0: i32) -> (i32, i32, i32) {
    %c0_i32 = arith.constant 0 : i32
    %c0_i32_0 = arith.constant 0 : i32
    %c0_i32_1 = arith.constant 0 : i32
    %c0_i32_2 = arith.constant 0 : i32
    return %c0_i32, %c0_i32_0, %c0_i32_1 : i32, i32, i32
  }
}

</mosaic_0001>

<bundles_post_ra>
// kernel: tpu_custom_call.1
= control target key start
LH: loop header
LB: loop body
LE: loop exit
PB: predicated region body
PF: predicated region fallthrough
CT: control target
= control target key end

     0   :  { %10 = vsyncpa [#allocation3], 0  ;;  %s2319_s0 = inlined_call_operand.hbm [shape: f32[4,128,256], index: 0, kind: input, shape index: {}]   ;;  %s2320_s1 = inlined_call_operand.vmem [shape: f32[128,8], index: 1, kind: input, shape index: {}]   ;;  %s2321_s2 = inlined_call_operand.vmem [shape: f32[1,8], index: 2, kind: input, shape index: {}]   ;;  %s2322_s3 = inlined_call_operand.vmem [shape: f32[8,128], index: 3, kind: input, shape index: {}]   ;;  %s2323_s4 = inlined_call_operand.vmem [shape: f32[1,128], index: 4, kind: input, shape index: {}]   ;;  %s2324_s5 = inlined_call_operand.hbm [shape: f32[4,128,256], index: 5, kind: output, shape index: {}]  }
   0x1   :  { %11 = vsyncpa [#allocation4], 0  ;;  %s1835_s18 = smov [#allocation2]   ;;  %s1787_s22 = scalar_lea.hbm %s2319_s0, 16384 }
   0x2   :  { %s17_s19 = sshll.u32 %s1835_s18, 4  ;;  %p1788_p0 = scmp.ne.s32.totalorder %s2319_s0, %s1787_s22  ;;  %s18_s19 = int_to_ptr.vmem [resolvable:$true] %s17_s19 }
   0x3   :  { %p1791_p1 = scmp.lt.u32.totalorder %s1787_s22, %s2319_s0 }
   0x5   :  { %p1793_p2 = pnand %p1791_p1, %p1788_p0 }
   0x7   :  { %1796 = shalt.err (!%p1793_p2)
}
   0x8   :  { %s1797_s27 = scalar_lea.vmem %s18_s19, 16384  ;;  %p1802_p4 = scmp.lt.s32.totalorder %s18_s19, %s18_s19 }
   0x9   :  { %p1798_p3 = scmp.ne.s32.totalorder %s18_s19, %s1797_s27  ;;  %p1803_p5 = scmp.lt.s32.totalorder %s1797_s27, %s1797_s27 }
   0xb   :  { %p1804_p6 = por %p1803_p5, %p1802_p4 }
   0xd   :  { %p1805_p7 = pnand %p1804_p6, %p1798_p3 }
   0xf   :  { %1808 = shalt.err (!%p1805_p7)
}
  0x10   :  { %s1836_s28 = smov 256   ;;  %s1837_s29 = smov 16  }
  0x11   :  { %23 = dma.hbm_to_vmem [thread:$0]  %s2319_s0, 16384, %s18_s19, [#allocation3], %s1836_s28, %s1836_s28, %s1837_s29  }
  0x12   :  { %1831 = dma.done.wait [#allocation3], 16384  }
  0x13   :  { %1832 = vsyncadd [#allocation3], 4294950912  ;;  %v67_v0 = vld [vmem:[#allocation2 + $0x100] sm:$0xff]  ;;  %v68_v1 = vld [vmem:[#allocation2 + $0x108] sm:$0xff]  ;;  %vm1839_vm0 = vmmov 0   ;;  %vm517_vm1 = vcmask 130112  }
  0x14   :  { %v35_v2 = vld [vmem:[#allocation2] sm:$0xff]  ;;  %v211_v3 = vadd.f32 %v68_v1, %v67_v0  ;;  %v36_v4 = vld [vmem:[#allocation2 + $0x8] sm:$0xff]  ;;  %v69_v5 = vld [vmem:[#allocation2 + $0x110] sm:$0xff]  ;;  %vm524_vm2 = vcmask 195712   ;;  %vm531_vm3 = vcmask 261312   ;;  %vm538_vm4 = vcmask 326912  }
  0x15   :  { %v70_v6 = vld [vmem:[#allocation2 + $0x118] sm:$0xff]  ;;  %v163_v7 = vadd.f32 %v36_v4, %v35_v2  ;;  %v37_v8 = vld [vmem:[#allocation2 + $0x10] sm:$0xff]  ;;  %v71_v12 = vld [vmem:[#allocation2 + $0x120] sm:$0xff]  ;;  %vm545_vm5 = vcmask 392512   ;;  %vm552_vm6 = vcmask 458112   ;;  %vm559_vm7 = vcmask 523712  }
  0x16   :  { %v38_v9 = vld [vmem:[#allocation2 + $0x18] sm:$0xff]  ;;  %212 = vadd.xlane.f32.xlu1 %v211_v3  ;;  %v214_v10 = vadd.f32 %v70_v6, %v69_v5  ;;  %v72_v13 = vld [vmem:[#allocation2 + $0x128] sm:$0xff]  ;;  %v39_v14 = vld [vmem:[#allocation2 + $0x20] sm:$0xff]  ;;  %vm566_vm8 = vcmask 589312   ;;  %vm573_vm9 = vcmask 654912   ;;  %vm580_vm10 = vcmask 720512  }
  0x17   :  { %164 = vadd.xlane.f32.xlu0 %v163_v7  ;;  %v166_v11 = vadd.f32 %v38_v9, %v37_v8  ;;  %v40_v15 = vld [vmem:[#allocation2 + $0x28] sm:$0xff]  ;;  %v217_v16 = vadd.f32 %v72_v13, %v71_v12  ;;  %v101_v18 = vld [vmem:[#allocation2 + $0x210] sm:$0xff]  ;;  %v102_v19 = vld [vmem:[#allocation2 + $0x218] sm:$0xff]  ;;  %vm587_vm11 = vcmask 786112   ;;  %vm594_vm12 = vcmask 851712  }
  0x18   :  { %v169_v17 = vadd.f32 %v40_v15, %v39_v14  ;;  %v99_v20 = vld [vmem:[#allocation2 + $0x200] sm:$0xff]  ;;  %v100_v21 = vld [vmem:[#allocation2 + $0x208] sm:$0xff]  ;;  %v262_v22 = vadd.f32 %v102_v19, %v101_v18  ;;  %v73_v24 = vld [vmem:[#allocation2 + $0x130] sm:$0xff]  ;;  %vm601_vm13 = vcmask 917312   ;;  %vm608_vm14 = vcmask 982912  }
  0x19   :  { %v259_v23 = vadd.f32 %v100_v21, %v99_v20  ;;  %v74_v25 = vld [vmem:[#allocation2 + $0x138] sm:$0xff]  ;;  %v41_v26 = vld [vmem:[#allocation2 + $0x30] sm:$0xff]  ;;  %v131_v30 = vld [vmem:[#allocation2 + $0x300] sm:$0xff]  ;;  %vm615_vm15 = vcmask 1048512  }
  0x1a   :  { %215 = vadd.xlane.f32.xlu1 %v214_v10  ;;  %v42_v27 = vld [vmem:[#allocation2 + $0x38] sm:$0xff]  ;;  %v220_v28 = vadd.f32 %v74_v25, %v73_v24  ;;  %v132_v31 = vld [vmem:[#allocation2 + $0x308] sm:$0xff]  ;;  %v103_v32 = vld [vmem:[#allocation2 + $0x220] sm:$0xff] }
  0x1b   :  { %167 = vadd.xlane.f32.xlu0 %v166_v11  ;;  %v172_v29 = vadd.f32 %v42_v27, %v41_v26  ;;  %v104_v33 = vld [vmem:[#allocation2 + $0x228] sm:$0xff]  ;;  %v307_v34 = vadd.f32 %v132_v31, %v131_v30  ;;  %v43_v36 = vld [vmem:[#allocation2 + $0x40] sm:$0xff]  ;;  %v133_v38 = vld [vmem:[#allocation2 + $0x310] sm:$0xff] }
  0x1c   :  { %v265_v35 = vadd.f32 %v104_v33, %v103_v32  ;;  %v44_v37 = vld [vmem:[#allocation2 + $0x48] sm:$0xff]  ;;  %v134_v39 = vld [vmem:[#allocation2 + $0x318] sm:$0xff]  ;;  %v105_v42 = vld [vmem:[#allocation2 + $0x230] sm:$0xff] }
  0x1d   :  { %v175_v40 = vadd.f32 %v44_v37, %v43_v36  ;;  %v310_v41 = vadd.f32 %v134_v39, %v133_v38  ;;  %v106_v43 = vld [vmem:[#allocation2 + $0x238] sm:$0xff]  ;;  %v75_v44 = vld [vmem:[#allocation2 + $0x140] sm:$0xff]  ;;  %v76_v45 = vld [vmem:[#allocation2 + $0x148] sm:$0xff] }
  0x1e   :  { %218 = vadd.xlane.f32.xlu1 %v217_v16  ;;  %v268_v46 = vadd.f32 %v106_v43, %v105_v42  ;;  %v223_v47 = vadd.f32 %v76_v45, %v75_v44  ;;  %v45_v48 = vld [vmem:[#allocation2 + $0x50] sm:$0xff]  ;;  %v46_v49 = vld [vmem:[#allocation2 + $0x58] sm:$0xff]  ;;  %v135_v50 = vld [vmem:[#allocation2 + $0x320] sm:$0xff] }
  0x1f   :  { %170 = vadd.xlane.f32.xlu0 %v169_v17  ;;  %v136_v51 = vld [vmem:[#allocation2 + $0x328] sm:$0xff]  ;;  %v178_v52 = vadd.f32 %v46_v49, %v45_v48  ;;  %v107_v54 = vld [vmem:[#allocation2 + $0x240] sm:$0xff]  ;;  %v77_v56 = vld [vmem:[#allocation2 + $0x150] sm:$0xff] }
  0x20   :  { %v313_v53 = vadd.f32 %v136_v51, %v135_v50  ;;  %v108_v55 = vld [vmem:[#allocation2 + $0x248] sm:$0xff]  ;;  %v78_v57 = vld [vmem:[#allocation2 + $0x158] sm:$0xff]  ;;  %v47_v60 = vld [vmem:[#allocation2 + $0x60] sm:$0xff] }
  0x21   :  { %v271_v58 = vadd.f32 %v108_v55, %v107_v54  ;;  %v226_v59 = vadd.f32 %v78_v57, %v77_v56  ;;  %v48_v61 = vld [vmem:[#allocation2 + $0x68] sm:$0xff]  ;;  %v137_v62 = vld [vmem:[#allocation2 + $0x330] sm:$0xff]  ;;  %v138_v63 = vld [vmem:[#allocation2 + $0x338] sm:$0xff] }
  0x22   :  { %263 = vadd.xlane.f32.xlu1 %v262_v22  ;;  %v181_v0 = vadd.f32 %v48_v61, %v47_v60  ;;  %v316_v1 = vadd.f32 %v138_v63, %v137_v62  ;;  %v109_v2 = vld [vmem:[#allocation2 + $0x250] sm:$0xff]  ;;  %v110_v3 = vld [vmem:[#allocation2 + $0x258] sm:$0xff]  ;;  %v79_v4 = vld [vmem:[#allocation2 + $0x160] sm:$0xff] }
  0x23   :  { %260 = vadd.xlane.f32.xlu0 %v259_v23  ;;  %v80_v5 = vld [vmem:[#allocation2 + $0x168] sm:$0xff]  ;;  %v274_v6 = vadd.f32 %v110_v3, %v109_v2  ;;  %v49_v8 = vld [vmem:[#allocation2 + $0x70] sm:$0xff]  ;;  %v50_v9 = vld [vmem:[#allocation2 + $0x78] sm:$0xff] }
  0x24   :  { %v229_v7 = vadd.f32 %v80_v5, %v79_v4  ;;  %v139_v10 = vld [vmem:[#allocation2 + $0x340] sm:$0xff]  ;;  %v140_v11 = vld [vmem:[#allocation2 + $0x348] sm:$0xff]  ;;  %v184_v12 = vadd.f32 %v50_v9, %v49_v8  ;;  %v81_v16 = vld [vmem:[#allocation2 + $0x170] sm:$0xff] }
  0x25   :  { %v319_v13 = vadd.f32 %v140_v11, %v139_v10  ;;  %v111_v14 = vld [vmem:[#allocation2 + $0x260] sm:$0xff]  ;;  %v112_v15 = vld [vmem:[#allocation2 + $0x268] sm:$0xff]  ;;  %v82_v17 = vld [vmem:[#allocation2 + $0x178] sm:$0xff] }
  0x26   :  { %221 = vadd.xlane.f32.xlu1 %v220_v28  ;;  %v277_v18 = vadd.f32 %v112_v15, %v111_v14  ;;  %v232_v19 = vadd.f32 %v82_v17, %v81_v16  ;;  %v51_v20 = vld [vmem:[#allocation2 + $0x80] sm:$0xff]  ;;  %v52_v21 = vld [vmem:[#allocation2 + $0x88] sm:$0xff]  ;;  %v141_v22 = vld [vmem:[#allocation2 + $0x350] sm:$0xff] }
  0x27   :  { %173 = vadd.xlane.f32.xlu0 %v172_v29  ;;  %v142_v23 = vld [vmem:[#allocation2 + $0x358] sm:$0xff]  ;;  %v187_v24 = vadd.f32 %v52_v21, %v51_v20  ;;  %v113_v26 = vld [vmem:[#allocation2 + $0x270] sm:$0xff]  ;;  %v83_v28 = vld [vmem:[#allocation2 + $0x180] sm:$0xff] }
  0x28   :  { %v322_v25 = vadd.f32 %v142_v23, %v141_v22  ;;  %v114_v27 = vld [vmem:[#allocation2 + $0x278] sm:$0xff]  ;;  %v84_v29 = vld [vmem:[#allocation2 + $0x188] sm:$0xff]  ;;  %v53_v32 = vld [vmem:[#allocation2 + $0x90] sm:$0xff] }
  0x29   :  { %v280_v30 = vadd.f32 %v114_v27, %v113_v26  ;;  %v235_v31 = vadd.f32 %v84_v29, %v83_v28  ;;  %v54_v33 = vld [vmem:[#allocation2 + $0x98] sm:$0xff]  ;;  %v115_v38 = vld [vmem:[#allocation2 + $0x280] sm:$0xff]  ;;  %v116_v39 = vld [vmem:[#allocation2 + $0x288] sm:$0xff] }
  0x2a   :  { %308 = vadd.xlane.f32.xlu1 %v307_v34  ;;  %v143_v34 = vld [vmem:[#allocation2 + $0x360] sm:$0xff]  ;;  %v190_v36 = vadd.f32 %v54_v33, %v53_v32  ;;  %v283_v42 = vadd.f32 %v116_v39, %v115_v38  ;;  %v56_v45 = vld [vmem:[#allocation2 + $0xa8] sm:$0xff]  ;;  %v117_v50 = vld [vmem:[#allocation2 + $0x290] sm:$0xff] }
  0x2b   :  { %266 = vadd.xlane.f32.xlu0 %v265_v35  ;;  %v144_v35 = vld [vmem:[#allocation2 + $0x368] sm:$0xff]  ;;  %v55_v44 = vld [vmem:[#allocation2 + $0xa0] sm:$0xff]  ;;  %v118_v51 = vld [vmem:[#allocation2 + $0x298] sm:$0xff] }
  0x2c   :  { %v325_v37 = vadd.f32 %v144_v35, %v143_v34  ;;  %v193_v48 = vadd.f32 %v56_v45, %v55_v44  ;;  %v286_v54 = vadd.f32 %v118_v51, %v117_v50  ;;  %v57_v56 = vld [vmem:[#allocation2 + $0xb0] sm:$0xff]  ;;  %v58_v57 = vld [vmem:[#allocation2 + $0xb8] sm:$0xff]  ;;  %v119_v62 = vld [vmem:[#allocation2 + $0x2a0] sm:$0xff] }
  0x2d   :  { %v196_v60 = vadd.f32 %v58_v57, %v57_v56  ;;  %v120_v63 = vld [vmem:[#allocation2 + $0x2a8] sm:$0xff]  ;;  %v59_v4 = vld [vmem:[#allocation2 + $0xc0] sm:$0xff]  ;;  %v121_v10 = vld [vmem:[#allocation2 + $0x2b0] sm:$0xff] }
  0x2e   :  { %176 = vadd.xlane.f32.xlu1 %v175_v40  ;;  %v85_v40 = vld [vmem:[#allocation2 + $0x190] sm:$0xff]  ;;  %v289_v2 = vadd.f32 %v120_v63, %v119_v62  ;;  %v60_v5 = vld [vmem:[#allocation2 + $0xc8] sm:$0xff]  ;;  %v122_v11 = vld [vmem:[#allocation2 + $0x2b8] sm:$0xff] }
  0x2f   :  { %311 = vadd.xlane.f32.xlu0 %v310_v41  ;;  %v86_v41 = vld [vmem:[#allocation2 + $0x198] sm:$0xff]  ;;  %v199_v8 = vadd.f32 %v60_v5, %v59_v4  ;;  %v292_v14 = vadd.f32 %v122_v11, %v121_v10  ;;  %v61_v16 = vld [vmem:[#allocation2 + $0xd0] sm:$0xff]  ;;  %v123_v22 = vld [vmem:[#allocation2 + $0x2c0] sm:$0xff] }
  0x30   :  { %v238_v43 = vadd.f32 %v86_v41, %v85_v40  ;;  %v62_v17 = vld [vmem:[#allocation2 + $0xd8] sm:$0xff]  ;;  %v124_v23 = vld [vmem:[#allocation2 + $0x2c8] sm:$0xff]  ;;  %v63_v28 = vld [vmem:[#allocation2 + $0xe0] sm:$0xff] }
  0x31   :  { %v202_v20 = vadd.f32 %v62_v17, %v61_v16  ;;  %v295_v26 = vadd.f32 %v124_v23, %v123_v22  ;;  %v64_v29 = vld [vmem:[#allocation2 + $0xe8] sm:$0xff]  ;;  %v125_v34 = vld [vmem:[#allocation2 + $0x2d0] sm:$0xff]  ;;  %v126_v35 = vld [vmem:[#allocation2 + $0x2d8] sm:$0xff] }
  0x32   :  { %269 = vadd.xlane.f32.xlu1 %v268_v46  ;;  %v145_v46 = vld [vmem:[#allocation2 + $0x370] sm:$0xff]  ;;  %v205_v32 = vadd.f32 %v64_v29, %v63_v28  ;;  %v298_v38 = vadd.f32 %v126_v35, %v125_v34  ;;  %v66_v41 = vld [vmem:[#allocation2 + $0xf8] sm:$0xff]  ;;  %v419_v51 = vld [vmem:[%s2320_s1] sm:$0xff] }
  0x33   :  { %224 = vadd.xlane.f32.xlu0 %v223_v47  ;;  %v146_v47 = vld [vmem:[#allocation2 + $0x378] sm:$0xff]  ;;  %v65_v40 = vld [vmem:[#allocation2 + $0xf0] sm:$0xff]  ;;  %v160_v4 = vld [vmem:[#allocation2 + $0x3e8] sm:$0xff] }
  0x34   :  { %v328_v49 = vadd.f32 %v146_v47, %v145_v46  ;;  %v208_v44 = vadd.f32 %v66_v41, %v65_v40  ;;  %v127_v46 = vld [vmem:[#allocation2 + $0x2e0] sm:$0xff]  ;;  %v128_v47 = vld [vmem:[#allocation2 + $0x2e8] sm:$0xff]  ;;  %v157_v57 = vld [vmem:[#allocation2 + $0x3d0] sm:$0xff] }
  0x35   :  { %v301_v50 = vadd.f32 %v128_v47, %v127_v46  ;;  %v422_v62 = vld [vmem:[%s2320_s1 + $0x18] sm:$0xff]  ;;  %v425_v10 = vld [vmem:[%s2320_s1 + $0x30] sm:$0xff] }
  0x36   :  { %179 = vadd.xlane.f32.xlu1 %v178_v52  ;;  %v87_v52 = vld [vmem:[#allocation2 + $0x1a0] sm:$0xff]  ;;  %v426_v11 = vld [vmem:[%s2320_s1 + $0x38] sm:$0xff]  ;;  %v429_v16 = vld [vmem:[%s2320_s1 + $0x50] sm:$0xff] }
  0x37   :  { %314 = vadd.xlane.f32.xlu0 %v313_v53  ;;  %v88_v53 = vld [vmem:[#allocation2 + $0x1a8] sm:$0xff]  ;;  %v430_v17 = vld [vmem:[%s2320_s1 + $0x58] sm:$0xff]  ;;  %v433_v22 = vld [vmem:[%s2320_s1 + $0x70] sm:$0xff] }
  0x38   :  { %v241_v55 = vadd.f32 %v88_v53, %v87_v52  ;;  %v420_v52 = vld [vmem:[%s2320_s1 + $0x8] sm:$0xff]  ;;  %v434_v23 = vld [vmem:[%s2320_s1 + $0x78] sm:$0xff] }
  0x39   :  { %v1625_v56 = vpack.c.bf16 %v420_v52, %v419_v51 }
  0x3a   :  { %272 = vadd.xlane.f32.xlu1 %v271_v58  ;;  %v147_v58 = vld [vmem:[#allocation2 + $0x380] sm:$0xff] }
  0x3b   :  { %227 = vadd.xlane.f32.xlu0 %v226_v59  ;;  %v148_v59 = vld [vmem:[#allocation2 + $0x388] sm:$0xff] }
  0x3c   :  { %v331_v61 = vadd.f32 %v148_v59, %v147_v58  ;;  %v158_v58 = vld [vmem:[#allocation2 + $0x3d8] sm:$0xff]  ;;  %v1838_v59 = vmov 0.0|0.0  }
  0x3d   :  { %1624 = vmatprep.subr.bf16.mxu0 %v1838_v59  ;;  %v346_v63 = vadd.f32 %v158_v58, %v157_v57 }
  0x3e   :  { %182 = vadd.xlane.f32.xlu1 %v181_v0  ;;  %v89_v0 = vld [vmem:[#allocation2 + $0x1b0] sm:$0xff]  ;;  %1626 = vmatpush3.bf16.msra.mxu0 %v1625_v56 }
  0x3f   :  { %317 = vadd.xlane.f32.xlu0 %v316_v1  ;;  %v90_v1 = vld [vmem:[#allocation2 + $0x1b8] sm:$0xff]  ;;  %1627 = vmatprep.subr.bf16.mxu0 %v1838_v59 }
  0x40   :  { %v244_v3 = vadd.f32 %v90_v1, %v89_v0  ;;  %v161_v0 = vld [vmem:[#allocation2 + $0x3f0] sm:$0xff]  ;;  %v162_v1 = vld [vmem:[#allocation2 + $0x3f8] sm:$0xff] }
  0x41   :  { %v352_v5 = vadd.f32 %v162_v1, %v161_v0 }
  0x42   :  { %275 = vadd.xlane.f32.xlu1 %v274_v6  ;;  %v149_v6 = vld [vmem:[#allocation2 + $0x390] sm:$0xff] }
  0x43   :  { %230 = vadd.xlane.f32.xlu0 %v229_v7  ;;  %v150_v7 = vld [vmem:[#allocation2 + $0x398] sm:$0xff] }
  0x44   :  { %v334_v9 = vadd.f32 %v150_v7, %v149_v6  ;;  %v423_v6 = vld [vmem:[%s2320_s1 + $0x20] sm:$0xff]  ;;  %v424_v7 = vld [vmem:[%s2320_s1 + $0x28] sm:$0xff] }
  0x46   :  { %185 = vadd.xlane.f32.xlu1 %v184_v12  ;;  %v91_v12 = vld [vmem:[#allocation2 + $0x1c0] sm:$0xff] }
  0x47   :  { %320 = vadd.xlane.f32.xlu0 %v319_v13  ;;  %v92_v13 = vld [vmem:[#allocation2 + $0x1c8] sm:$0xff] }
  0x48   :  { %v247_v15 = vadd.f32 %v92_v13, %v91_v12  ;;  %v1634_v12 = vpack.c.bf16 %v426_v11, %v425_v10  ;;  %v427_v13 = vld [vmem:[%s2320_s1 + $0x40] sm:$0xff] }
  0x4a   :  { %278 = vadd.xlane.f32.xlu1 %v277_v18  ;;  %v151_v18 = vld [vmem:[#allocation2 + $0x3a0] sm:$0xff] }
  0x4b   :  { %233 = vadd.xlane.f32.xlu0 %v232_v19  ;;  %v152_v19 = vld [vmem:[#allocation2 + $0x3a8] sm:$0xff] }
  0x4c   :  { %v337_v21 = vadd.f32 %v152_v19, %v151_v18  ;;  %v1640_v18 = vpack.c.bf16 %v430_v17, %v429_v16  ;;  %v431_v19 = vld [vmem:[%s2320_s1 + $0x60] sm:$0xff] }
  0x4e   :  { %188 = vadd.xlane.f32.xlu1 %v187_v24  ;;  %v93_v24 = vld [vmem:[#allocation2 + $0x1d0] sm:$0xff] }
  0x4f   :  { %323 = vadd.xlane.f32.xlu0 %v322_v25  ;;  %v94_v25 = vld [vmem:[#allocation2 + $0x1d8] sm:$0xff] }
  0x50   :  { %v250_v27 = vadd.f32 %v94_v25, %v93_v24  ;;  %v1646_v25 = vpack.c.bf16 %v434_v23, %v433_v22 }
  0x52   :  { %281 = vadd.xlane.f32.xlu1 %v280_v30  ;;  %v153_v30 = vld [vmem:[#allocation2 + $0x3b0] sm:$0xff] }
  0x53   :  { %236 = vadd.xlane.f32.xlu0 %v235_v31  ;;  %v154_v31 = vld [vmem:[#allocation2 + $0x3b8] sm:$0xff] }
  0x54   :  { %v340_v33 = vadd.f32 %v154_v31, %v153_v30 }
  0x56   :  { %191 = vadd.xlane.f32.xlu1 %v190_v36  ;;  %v95_v36 = vld [vmem:[#allocation2 + $0x1e0] sm:$0xff] }
  0x57   :  { %326 = vadd.xlane.f32.xlu0 %v325_v37  ;;  %v96_v37 = vld [vmem:[#allocation2 + $0x1e8] sm:$0xff] }
  0x58   :  { %v253_v39 = vadd.f32 %v96_v37, %v95_v36 }
  0x5a   :  { %284 = vadd.xlane.f32.xlu1 %v283_v42  ;;  %v155_v42 = vld [vmem:[#allocation2 + $0x3c0] sm:$0xff] }
  0x5b   :  { %239 = vadd.xlane.f32.xlu0 %v238_v43  ;;  %v156_v43 = vld [vmem:[#allocation2 + $0x3c8] sm:$0xff] }
  0x5c   :  { %v343_v45 = vadd.f32 %v156_v43, %v155_v42 }
  0x5e   :  { %194 = vadd.xlane.f32.xlu1 %v193_v48  ;;  %v97_v48 = vld [vmem:[#allocation2 + $0x1f0] sm:$0xff] }
  0x5f   :  { %329 = vadd.xlane.f32.xlu0 %v328_v49  ;;  %v98_v49 = vld [vmem:[#allocation2 + $0x1f8] sm:$0xff] }
  0x60   :  { %v256_v53 = vadd.f32 %v98_v49, %v97_v48 }
  0x62   :  { %287 = vadd.xlane.f32.xlu1 %v286_v54  ;;  %v129_v54 = vld [vmem:[#allocation2 + $0x2f0] sm:$0xff] }
  0x63   :  { %242 = vadd.xlane.f32.xlu0 %v241_v55  ;;  %v130_v55 = vld [vmem:[#allocation2 + $0x2f8] sm:$0xff] }
  0x66   :  { %197 = vadd.xlane.f32.xlu1 %v196_v60  ;;  %v304_v60 = vadd.f32 %v130_v55, %v129_v54 }
  0x67   :  { %332 = vadd.xlane.f32.xlu0 %v331_v61  ;;  %v421_v61 = vld [vmem:[%s2320_s1 + $0x10] sm:$0xff] }
  0x6a   :  { %290 = vadd.xlane.f32.xlu1 %v289_v2  ;;  %v1628_v2 = vpack.c.bf16 %v422_v62, %v421_v61 }
  0x6b   :  { %245 = vadd.xlane.f32.xlu0 %v244_v3  ;;  %v159_v3 = vld [vmem:[#allocation2 + $0x3e0] sm:$0xff] }
  0x6c   :  { %1629 = vmatpush3.bf16.msra.mxu0 %v1628_v2 }
  0x6d   :  { %1630 = vmatprep.subr.bf16.mxu0 %v1838_v59 }
  0x6e   :  { %200 = vadd.xlane.f32.xlu1 %v199_v8  ;;  %v349_v8 = vadd.f32 %v160_v4, %v159_v3 }
  0x6f   :  { %335 = vadd.xlane.f32.xlu0 %v334_v9  ;;  %v1631_v9 = vpack.c.bf16 %v424_v7, %v423_v6 }
  0x71   :  { %1632 = vmatpush3.bf16.msra.mxu0 %v1631_v9 }
  0x72   :  { %293 = vadd.xlane.f32.xlu1 %v292_v14  ;;  %1633 = vmatprep.subr.bf16.mxu0 %v1838_v59  ;;  %v428_v14 = vld [vmem:[%s2320_s1 + $0x48] sm:$0xff] }
  0x73   :  { %248 = vadd.xlane.f32.xlu0 %v247_v15  ;;  %v1637_v15 = vpack.c.bf16 %v428_v14, %v427_v13 }
  0x75   :  { %1635 = vmatpush3.bf16.msra.mxu0 %v1634_v12 }
  0x76   :  { %203 = vadd.xlane.f32.xlu1 %v202_v20  ;;  %1636 = vmatprep.subr.bf16.mxu0 %v1838_v59  ;;  %v432_v20 = vld [vmem:[%s2320_s1 + $0x68] sm:$0xff] }
  0x77   :  { %338 = vadd.xlane.f32.xlu0 %v337_v21  ;;  %v1643_v21 = vpack.c.bf16 %v432_v20, %v431_v19 }
  0x79   :  { %1638 = vmatpush3.bf16.msra.mxu0 %v1637_v15 }
  0x7a   :  { %296 = vadd.xlane.f32.xlu1 %v295_v26  ;;  %1639 = vmatprep.subr.bf16.mxu0 %v1838_v59 }
  0x7b   :  { %251 = vadd.xlane.f32.xlu0 %v250_v27  ;;  %v1840_v27 = vmov 0.0  }
  0x7c   :  { %1616 = vmatprep.mubr.msk.f32.mxu0 %vm1839_vm0, %v1840_v27  ;;  %1619 = vmatprep.subr.mxu1 %v1840_v27 }
  0x7d   :  { %1641 = vmatpush3.bf16.msra.mxu0 %v1640_v18  ;;  %1621 = vmatprep.mubr.msk.f32.mxu1 %vm1839_vm0, %v1840_v27  ;;  %vm854_vm0 = vcmask 1041409  }
  0x7e   :  { %206 = vadd.xlane.f32.xlu1 %v205_v32  ;;  %1642 = vmatprep.subr.bf16.mxu0 %v1838_v59 }
  0x7f   :  { %341 = vadd.xlane.f32.xlu0 %v340_v33 }
  0x81   :  { %1644 = vmatpush3.bf16.msra.mxu0 %v1643_v21 }
  0x82   :  { %299 = vadd.xlane.f32.xlu1 %v298_v38  ;;  %1645 = vmatprep.subr.bf16.mxu0 %v1838_v59 }
  0x83   :  { %254 = vadd.xlane.f32.xlu0 %v253_v39 }
  0x85   :  { %1647 = vmatpush3.bf16.msra.mxu0 %v1646_v25 }
  0x86   :  { %209 = vadd.xlane.f32.xlu1 %v208_v44 }
  0x87   :  { %344 = vadd.xlane.f32.xlu0 %v343_v45 }
  0x8a   :  { %302 = vadd.xlane.f32.xlu1 %v301_v50 }
  0x8b   :  { %257 = vadd.xlane.f32.xlu0 %v256_v53 }
  0x8e   :  { %305 = vadd.xlane.f32.xlu1 %v304_v60  ;;  %v506_v60 = vlaneseq }
  0x8f   :  { %347 = vadd.xlane.f32.xlu0 %v346_v63 }
  0x90   :  { %v507_v63 = vand.u32 127, %v506_v60  ;;  %v2009_v1 = vshrl.u32 %v506_v60, 7 }
  0x92   :  { %353 = vadd.xlane.f32.xlu1 %v352_v5  ;;  %v512_v3 = vadd.s32 4294967288, %v507_v63  ;;  %v519_v4 = vadd.s32 4294967280, %v507_v63  ;;  %v526_v5 = vadd.s32 4294967272, %v507_v63  ;;  %v533_v6 = vadd.s32 4294967264, %v507_v63 }
  0x93   :  { %350 = vadd.xlane.f32.xlu0 %v349_v8  ;;  %v540_v7 = vadd.s32 4294967256, %v507_v63  ;;  %v547_v8 = vadd.s32 4294967248, %v507_v63  ;;  %v554_v9 = vadd.s32 4294967240, %v507_v63  ;;  %v561_v10 = vadd.s32 4294967232, %v507_v63 }
  0x94   :  { %v2016_v12 = vsub.s32 %v507_v63, %v2009_v1  ;;  %v568_v13 = vadd.s32 4294967224, %v507_v63  ;;  %v575_v14 = vadd.s32 4294967216, %v507_v63  ;;  %v582_v16 = vadd.s32 4294967208, %v507_v63 }
  0x95   :  { %v2021_v17 = vsub.s32 %v512_v3, %v2009_v1  ;;  %v2024_v18 = vsub.s32 %v519_v4, %v2009_v1  ;;  %v589_v19 = vadd.s32 4294967200, %v507_v63  ;;  %v2027_v20 = vsub.s32 %v526_v5, %v2009_v1 }
  0x96   :  { %v2030_v21 = vsub.s32 %v533_v6, %v2009_v1  ;;  %v2033_v22 = vsub.s32 %v540_v7, %v2009_v1  ;;  %v2036_v23 = vsub.s32 %v547_v8, %v2009_v1  ;;  %v2039_v25 = vsub.s32 %v554_v9, %v2009_v1 }
  0x97   :  { %v2042_v27 = vsub.s32 %v561_v10, %v2009_v1  ;;  %v596_v3 = vadd.s32 4294967192, %v507_v63  ;;  %v603_v4 = vadd.s32 4294967184, %v507_v63  ;;  %v2048_v6 = vsub.s32 %v568_v13, %v2009_v1 }
  0x98   :  { %v2051_v7 = vsub.s32 %v575_v14, %v2009_v1  ;;  %v2054_v8 = vsub.s32 %v582_v16, %v2009_v1 }
  0x9a   :  { %2332 = vst [vmem:[#allocation10_spill] sm:$0xff] %v2051_v7  ;;  %2333 = vst [vmem:[#allocation11_spill] sm:$0xff] %v2054_v8 }
  0xa3   :  { %v1935_v24 = vpop.xlane.xlu1 %212 }
  0xa4   :  { %v1937_v26 = vpop.xlane.xlu0 %164  ;;  %v371_v10 = vmul.f32 0.00390625, %v1935_v24 }
  0xa5   :  { %v355_v8 = vmul.f32 0.00390625, %v1937_v26 }
  0xa6   :  { %v620_v26 = vrot.slane %v371_v10, %v2016_v12 }
  0xa7   :  { %v1939_v28 = vpop.xlane.xlu1 %215 }
  0xa8   :  { %v1941_v29 = vpop.xlane.xlu0 %167  ;;  %v372_v5 = vmul.f32 0.00390625, %v1939_v28  ;;  %v2062_v28 = vsub.s32 %v589_v19, %v2009_v1 }
  0xaa   :  { %2335 = vst [vmem:[#allocation13_spill] sm:$0xff] %v2062_v28 }
  0xab   :  { %v1943_v30 = vpop.xlane.xlu1 %218 }
  0xac   :  { %v1945_v31 = vpop.xlane.xlu0 %170 }
  0xad   :  { %v357_v13 = vmul.f32 0.00390625, %v1945_v31  ;;  %v624_v31 = vrot.slane %v372_v5, %v2021_v17 }
  0xaf   :  { %v1947_v32 = vpop.xlane.xlu1 %263 }
  0xb0   :  { %v1949_v33 = vpop.xlane.xlu0 %260  ;;  %v388_v14 = vmul.f32 0.00390625, %v1947_v32 }
  0xb1   :  { %v387_v7 = vmul.f32 0.00390625, %v1949_v33 }
  0xb3   :  { %v1951_v34 = vpop.xlane.xlu1 %221  ;;  %v699_v5 = vrot.slane %v387_v7, %v2016_v12 }
  0xb4   :  { %v1953_v35 = vpop.xlane.xlu0 %173  ;;  %v374_v16 = vmul.f32 0.00390625, %v1951_v34  ;;  %v610_v34 = vadd.s32 4294967176, %v507_v63 }
  0xb5   :  { %v358_v24 = vmul.f32 0.00390625, %v1953_v35 }
  0xb7   :  { %v1955_v36 = vpop.xlane.xlu1 %308  ;;  %v530_v63 = vrot.slane %v358_v24, %v2027_v20 }
  0xb8   :  { %v1957_v37 = vpop.xlane.xlu0 %266  ;;  %v403_v10 = vmul.f32 0.00390625, %v1955_v36 }
  0xb9   :  { %v389_v32 = vmul.f32 0.00390625, %v1957_v37  ;;  %v634_v37 = vrot.slane %v374_v16, %v2027_v20 }
  0xbb   :  { %v1959_v38 = vpop.xlane.xlu1 %176 }
  0xbc   :  { %v1961_v39 = vpop.xlane.xlu0 %311  ;;  %v359_v33 = vmul.f32 0.00390625, %v1959_v38  ;;  %v511_v38 = vrot.slane %v355_v8, %v2016_v12 }
  0xbf   :  { %v1963_v40 = vpop.xlane.xlu1 %269 }
  0xc0   :  { %v1965_v41 = vpop.xlane.xlu0 %224 }
  0xc1   :  { %v375_v7 = vmul.f32 0.00390625, %v1965_v41 }
  0xc3   :  { %v1967_v42 = vpop.xlane.xlu1 %179 }
  0xc4   :  { %v1969_v43 = vpop.xlane.xlu0 %314 }
  0xc7   :  { %v1971_v44 = vpop.xlane.xlu1 %272 }
  0xc8   :  { %v1973_v45 = vpop.xlane.xlu0 %227 }
  0xcb   :  { %v1975_v46 = vpop.xlane.xlu1 %182 }
  0xcc   :  { %v1977_v47 = vpop.xlane.xlu0 %317 }
  0xcf   :  { %v1979_v48 = vpop.xlane.xlu1 %275 }
  0xd0   :  { %v1981_v49 = vpop.xlane.xlu0 %230 }
  0xd3   :  { %v1983_v50 = vpop.xlane.xlu1 %185 }
  0xd4   :  { %v1985_v51 = vpop.xlane.xlu0 %320 }
  0xd7   :  { %v1987_v52 = vpop.xlane.xlu1 %278 }
  0xd8   :  { %v1989_v53 = vpop.xlane.xlu0 %233 }
  0xdb   :  { %v1991_v54 = vpop.xlane.xlu1 %188 }
  0xdc   :  { %v1993_v55 = vpop.xlane.xlu0 %323 }
  0xdf   :  { %v1995_v56 = vpop.xlane.xlu1 %281 }
  0xe0   :  { %v1997_v57 = vpop.xlane.xlu0 %236 }
  0xe3   :  { %v1999_v58 = vpop.xlane.xlu1 %191 }
  0xe4   :  { %v2001_v59 = vpop.xlane.xlu0 %326 }
  0xe7   :  { %v2003_v61 = vpop.xlane.xlu1 %284 }
  0xe8   :  { %v2005_v62 = vpop.xlane.xlu0 %239 }
  0xeb   :  { %v2007_v0 = vpop.xlane.xlu1 %194 }
  0xec   :  { %v2011_v2 = vpop.xlane.xlu0 %329 }
  0xef   :  { %v2013_v11 = vpop.xlane.xlu1 %287 }
  0xf0   :  { %v2018_v15 = vpop.xlane.xlu0 %242 }
  0xf1   :  { %2330 = vst [vmem:[#allocation8_spill] sm:$0xff] %v2018_v15  ;;  %v356_v15 = vmul.f32 0.00390625, %v1941_v29  ;;  %v2073_v29 = vsub.s32 %v596_v3, %v2009_v1  ;;  %v404_v3 = vmul.f32 0.00390625, %v1961_v39  ;;  %v625_v39 = vsel %vm517_vm1, %v624_v31, %v620_v26 }
  0xf2   :  { %v778_v26 = vrot.slane %v403_v10, %v2016_v12  ;;  %v376_v12 = vmul.f32 0.00390625, %v1973_v45  ;;  %v362_v10 = vmul.f32 0.00390625, %v1983_v50  ;;  %v393_v45 = vmul.f32 0.00390625, %v1987_v52 }
  0xf3   :  { %v2044_v60 = vpop.xlane.xlu1 %197  ;;  %2336 = vst [vmem:[#allocation14_spill] sm:$0xff] %v2073_v29  ;;  %v516_v35 = vrot.slane %v356_v15, %v2021_v17  ;;  %v390_v15 = vmul.f32 0.00390625, %v1963_v40  ;;  %v782_v36 = vrot.slane %v404_v3, %v2021_v17  ;;  %v2107_v40 = vsub.s32 %v610_v34, %v2009_v1 }
  0xf4   :  { %2331 = vst [vmem:[#allocation9_spill] sm:$0xff] %v2044_v60  ;;  %v2056_v9 = vpop.xlane.xlu0 %332  ;;  %v373_v60 = vmul.f32 0.00390625, %v1943_v30  ;;  %v2076_v30 = vsub.s32 %v603_v4, %v2009_v1  ;;  %v523_v4 = vrot.slane %v357_v13, %v2024_v18  ;;  %v708_v13 = vrot.slane %v389_v32, %v2024_v18 }
  0xf5   :  { %2334 = vst [vmem:[#allocation12_spill] sm:$0xff] %v2056_v9  ;;  %v518_v8 = vsel %vm517_vm1, %v516_v35, %v511_v38  ;;  %v639_v3 = vrot.slane %v375_v7, %v2030_v21  ;;  %v392_v38 = vmul.f32 0.00390625, %v1979_v48  ;;  %v378_v48 = vmul.f32 0.00390625, %v1989_v53 }
  0xf6   :  { %2337 = vst [vmem:[#allocation15_spill] sm:$0xff] %v2076_v30  ;;  %v629_v28 = vrot.slane %v373_v60, %v2024_v18  ;;  %v703_v30 = vrot.slane %v388_v14, %v2021_v17  ;;  %v537_v14 = vrot.slane %v359_v33, %v2030_v21  ;;  %v525_v29 = vsel %vm524_vm2, %v523_v4, %v518_v8 }
  0xf7   :  { %v2070_v9 = vpop.xlane.xlu1 %290  ;;  %v360_v33 = vmul.f32 0.00390625, %v1967_v42  ;;  %v532_v41 = vsel %vm531_vm3, %v530_v63, %v525_v29  ;;  %v405_v17 = vmul.f32 0.00390625, %v1969_v43  ;;  %v391_v42 = vmul.f32 0.00390625, %v1971_v44 }
  0xf8   :  { %v2081_v19 = vpop.xlane.xlu0 %245  ;;  %v630_v24 = vsel %vm524_vm2, %v629_v28, %v625_v39  ;;  %v704_v31 = vsel %vm517_vm1, %v703_v30, %v699_v5  ;;  %v713_v28 = vrot.slane %v390_v15, %v2027_v20  ;;  %v539_v30 = vsel %vm538_vm4, %v537_v14, %v532_v41 }
  0xf9   :  { %v635_v32 = vsel %vm531_vm3, %v634_v37, %v630_v24  ;;  %v709_v35 = vsel %vm524_vm2, %v708_v13, %v704_v31  ;;  %v783_v29 = vsel %vm517_vm1, %v782_v36, %v778_v26  ;;  %v361_v5 = vmul.f32 0.00390625, %v1975_v46 }
  0xfa   :  { %v406_v43 = vmul.f32 0.00390625, %v1977_v47  ;;  %v544_v37 = vrot.slane %v360_v33, %v2033_v22  ;;  %v377_v63 = vmul.f32 0.00390625, %v1981_v49  ;;  %v714_v44 = vsel %vm531_vm3, %v713_v28, %v709_v35 }
  0xfb   :  { %v2095_v60 = vpop.xlane.xlu1 %200  ;;  %v787_v15 = vrot.slane %v405_v17, %v2024_v18  ;;  %v407_v39 = vmul.f32 0.00390625, %v1985_v51  ;;  %v640_v47 = vsel %vm538_vm4, %v639_v3, %v635_v32  ;;  %v718_v13 = vrot.slane %v391_v42, %v2030_v21 }
  0xfc   :  { %v2101_v16 = vpop.xlane.xlu0 %335  ;;  %v363_v49 = vmul.f32 0.00390625, %v1991_v54  ;;  %v644_v50 = vrot.slane %v376_v12, %v2033_v22  ;;  %v551_v18 = vrot.slane %v361_v5, %v2036_v23  ;;  %v792_v51 = vrot.slane %v406_v43, %v2027_v20 }
  0xfd   :  { %v408_v52 = vmul.f32 0.00390625, %v1993_v55  ;;  %v546_v7 = vsel %vm545_vm5, %v544_v37, %v539_v30  ;;  %v723_v8 = vrot.slane %v392_v38, %v2033_v22  ;;  %v649_v24 = vrot.slane %v377_v63, %v2036_v23 }
  0xfe   :  { %v558_v53 = vrot.slane %v362_v10, %v2039_v25  ;;  %v788_v54 = vsel %vm524_vm2, %v787_v15, %v783_v29  ;;  %v797_v36 = vrot.slane %v407_v39, %v2030_v21  ;;  %v728_v31 = vrot.slane %v393_v45, %v2036_v23 }
  0xff   :  { %v2117_v34 = vpop.xlane.xlu1 %293  ;;  %v394_v32 = vmul.f32 0.00390625, %v1995_v56  ;;  %v719_v55 = vsel %vm538_vm4, %v718_v13, %v714_v44  ;;  %v654_v33 = vrot.slane %v378_v48, %v2039_v25  ;;  %v565_v41 = vrot.slane %v363_v49, %v2042_v27  ;;  %v2338_v13 = vld [vmem:[#allocation8_spill] sm:$0xff]  ;;  %v2339_v49 = vld [vmem:[#allocation9_spill] sm:$0xff] }
 0x100   :  { %v2123_v4 = vpop.xlane.xlu0 %248  ;;  %v379_v26 = vmul.f32 0.00390625, %v1997_v57  ;;  %v645_v17 = vsel %vm545_vm5, %v644_v50, %v640_v47  ;;  %v553_v21 = vsel %vm552_vm6, %v551_v18, %v546_v7  ;;  %v793_v35 = vsel %vm531_vm3, %v792_v51, %v788_v54  ;;  %v2340_v51 = vld [vmem:[#allocation12_spill] sm:$0xff]  ;;  %v2341_v54 = vld [vmem:[#allocation10_spill] sm:$0xff] }
 0x101   :  { %v802_v56 = vrot.slane %v408_v52, %v2033_v22  ;;  %v724_v30 = vsel %vm545_vm5, %v723_v8, %v719_v55  ;;  %v650_v3 = vsel %vm552_vm6, %v649_v24, %v645_v17  ;;  %v560_v42 = vsel %vm559_vm7, %v558_v53, %v553_v21 }
 0x102   :  { %v364_v29 = vmul.f32 0.00390625, %v1999_v58  ;;  %v798_v57 = vsel %vm538_vm4, %v797_v36, %v793_v35  ;;  %v729_v12 = vsel %vm552_vm6, %v728_v31, %v724_v30  ;;  %v733_v5 = vrot.slane %v394_v32, %v2039_v25  ;;  %v2343_v35 = vld [vmem:[#allocation13_spill] sm:$0xff] }
 0x103   :  { %v2137_v46 = vpop.xlane.xlu1 %203  ;;  %v409_v43 = vmul.f32 0.00390625, %v2001_v59  ;;  %v655_v22 = vsel %vm559_vm7, %v654_v33, %v650_v3  ;;  %v567_v38 = vsel %vm566_vm8, %v565_v41, %v560_v42  ;;  %v659_v63 = vrot.slane %v379_v26, %v2042_v27  ;;  %v2342_v33 = vld [vmem:[#allocation11_spill] sm:$0xff] }
 0x104   :  { %v2143_v14 = vpop.xlane.xlu0 %338  ;;  %v395_v58 = vmul.f32 0.00390625, %v2003_v61  ;;  %v803_v44 = vsel %vm545_vm5, %v802_v56, %v798_v57  ;;  %v380_v15 = vmul.f32 0.00390625, %v2005_v62  ;;  %v365_v39 = vmul.f32 0.00390625, %v2007_v0 }
 0x105   :  { %v410_v59 = vmul.f32 0.00390625, %v2011_v2  ;;  %v572_v45 = vrot.slane %v364_v29, %v2048_v6  ;;  %v396_v47 = vmul.f32 0.00390625, %v2013_v11  ;;  %v381_v48 = vmul.f32 0.00390625, %v2338_v13 }
 0x106   :  { %v366_v50 = vmul.f32 0.00390625, %v2339_v49  ;;  %v734_v61 = vsel %vm559_vm7, %v733_v5, %v729_v12  ;;  %v807_v18 = vrot.slane %v409_v43, %v2036_v23  ;;  %v411_v52 = vmul.f32 0.00390625, %v2340_v51 }
 0x107   :  { %v2157_v20 = vpop.xlane.xlu1 %296  ;;  %v397_v62 = vmul.f32 0.00390625, %v2070_v9  ;;  %v660_v2 = vsel %vm566_vm8, %v659_v63, %v655_v22  ;;  %v738_v7 = vrot.slane %v395_v58, %v2042_v27  ;;  %v382_v8 = vmul.f32 0.00390625, %v2081_v19 }
 0x108   :  { %v2163_v28 = vpop.xlane.xlu0 %251  ;;  %v367_v11 = vmul.f32 0.00390625, %v2095_v60  ;;  %v664_v53 = vrot.slane %v380_v15, %v2048_v6  ;;  %v579_v36 = vrot.slane %v365_v39, %v2341_v54  ;;  %v812_v23 = vrot.slane %v410_v59, %v2039_v25 }
 0x109   :  { %v412_v31 = vmul.f32 0.00390625, %v2101_v16  ;;  %v574_v9 = vsel %vm573_vm9, %v572_v45, %v567_v38  ;;  %v743_v32 = vrot.slane %v396_v47, %v2048_v6  ;;  %v669_v55 = vrot.slane %v381_v48, %v2341_v54  ;;  %v2344_v48 = vld [vmem:[#allocation14_spill] sm:$0xff] }
 0x10a   :  { %v586_v41 = vrot.slane %v366_v50, %v2342_v33  ;;  %v808_v19 = vsel %vm552_vm6, %v807_v18, %v803_v44  ;;  %v817_v60 = vrot.slane %v411_v52, %v2042_v27  ;;  %v748_v26 = vrot.slane %v397_v62, %v2341_v54 }
 0x10b   :  { %v2177_v37 = vpop.xlane.xlu1 %206  ;;  %v398_v17 = vmul.f32 0.00390625, %v2117_v34  ;;  %v739_v16 = vsel %vm566_vm8, %v738_v7, %v734_v61  ;;  %v674_v21 = vrot.slane %v382_v8, %v2342_v33  ;;  %v593_v56 = vrot.slane %v367_v11, %v2343_v35 }
 0x10c   :  { %v2183_v10 = vpop.xlane.xlu0 %341  ;;  %v383_v30 = vmul.f32 0.00390625, %v2123_v4  ;;  %v665_v42 = vsel %vm573_vm9, %v664_v53, %v660_v2  ;;  %v581_v29 = vsel %vm580_vm10, %v579_v36, %v574_v9  ;;  %v813_v27 = vsel %vm559_vm7, %v812_v23, %v808_v19 }
 0x10d   :  { %v822_v57 = vrot.slane %v412_v31, %v2048_v6  ;;  %v744_v34 = vsel %vm573_vm9, %v743_v32, %v739_v16  ;;  %v670_v12 = vsel %vm580_vm10, %v669_v55, %v665_v42  ;;  %v588_v5 = vsel %vm587_vm11, %v586_v41, %v581_v29 }
 0x10e   :  { %v368_v43 = vmul.f32 0.00390625, %v2137_v46  ;;  %v818_v22 = vsel %vm566_vm8, %v817_v60, %v813_v27  ;;  %v749_v4 = vsel %vm580_vm10, %v748_v26, %v744_v34  ;;  %v753_v38 = vrot.slane %v398_v17, %v2342_v33 }
 0x10f   :  { %v300_v0 = vpop.xlane.xlu1 %299  ;;  %v399_v63 = vmul.f32 0.00390625, %v2157_v20  ;;  %v675_v44 = vsel %vm587_vm11, %v674_v21, %v670_v12  ;;  %v595_v6 = vsel %vm594_vm12, %v593_v56, %v588_v5  ;;  %v679_v15 = vrot.slane %v383_v30, %v2343_v35 }
 0x110   :  { %v255_v24 = vpop.xlane.xlu0 %254  ;;  %v384_v39 = vmul.f32 0.00390625, %v2163_v28  ;;  %v823_v46 = vsel %vm573_vm9, %v822_v57, %v818_v22  ;;  %v413_v45 = vmul.f32 0.00390625, %v2143_v14  ;;  %v400_v47 = vmul.f32 0.00390625, %v300_v0 }
 0x111   :  { %v385_v13 = vmul.f32 0.00390625, %v255_v24  ;;  %v600_v20 = vrot.slane %v368_v43, %v2344_v48  ;;  %v414_v49 = vmul.f32 0.00390625, %v2183_v10  ;;  %v754_v18 = vsel %vm587_vm11, %v753_v38, %v749_v4  ;;  %v2345_v24 = vld [vmem:[#allocation15_spill] sm:$0xff] }
 0x112   :  { %v758_v28 = vrot.slane %v399_v63, %v2343_v35  ;;  %v369_v51 = vmul.f32 0.00390625, %v2177_v37  ;;  %vm856_vm1 = vcmask 1042434   ;;  %v680_v14 = vsel %vm594_vm12, %v679_v15, %v675_v44  ;;  %v1561_v44 = vld [vmem:[%s2321_s2] ss:$0 sm:$0xff]  ;;  %s1841_s2 = smov [#allocation5]  }
 0x113   :  { %v210_v25 = vpop.xlane.xlu1 %209  ;;  %v684_v0 = vrot.slane %v384_v39, %v2344_v48  ;;  %v827_v10 = vrot.slane %v413_v45, %v2341_v54  ;;  %v763_v11 = vrot.slane %v400_v47, %v2344_v48  ;;  %v689_v53 = vrot.slane %v385_v13, %v2345_v24 }
 0x114   :  { %v345_v3 = vpop.xlane.xlu0 %344  ;;  %v370_v2 = vmul.f32 0.00390625, %v210_v25  ;;  %v602_v23 = vsel %vm601_vm13, %v600_v20, %v595_v6  ;;  %v832_v37 = vrot.slane %v414_v49, %v2342_v33  ;;  %v759_v32 = vsel %vm594_vm12, %v758_v28, %v754_v18 }
 0x115   :  { %v415_v52 = vmul.f32 0.00390625, %v345_v3  ;;  %v607_v55 = vrot.slane %v369_v51, %v2345_v24  ;;  %v685_v60 = vsel %vm601_vm13, %v684_v0, %v680_v14  ;;  %v828_v16 = vsel %vm580_vm10, %v827_v10, %v823_v46  ;;  %v1562_v46 = vld [vmem:[%s2323_s4] ss:$0 sm:$0xff]  ;;  %v1660_v10 = vld [vmem:[#allocation2 + $0x18] sm:$0xff] }
 0x116   :  { %v614_v26 = vrot.slane %v370_v2, %v2107_v40  ;;  %v764_v21 = vsel %vm601_vm13, %v763_v11, %v759_v32  ;;  %v690_v56 = vsel %vm608_vm14, %v689_v53, %v685_v60  ;;  %vm858_vm2 = vcmask 1043459   ;;  %v1666_v60 = vld [vmem:[#allocation2 + $0x48] sm:$0xff] }
 0x117   :  { %v303_v58 = vpop.xlane.xlu1 %302  ;;  %v837_v41 = vrot.slane %v415_v52, %v2343_v35  ;;  %v833_v35 = vsel %vm587_vm11, %v832_v37, %v828_v16  ;;  %v609_v27 = vsel %vm608_vm14, %v607_v55, %v602_v23  ;;  %vm940_vm3 = vcmask 64512   ;;  %v1664_v55 = vld [vmem:[#allocation2 + $0x28] sm:$0xff] }
 0x118   :  { %v258_v59 = vpop.xlane.xlu0 %257  ;;  %v401_v50 = vmul.f32 0.00390625, %v303_v58  ;;  %v616_v5 = vsel %vm615_vm15, %v614_v26, %v609_v27  ;;  %v932_v58 = vld [vmem:[%s2322_s3] sm:$0xff]  ;;  %v1089_v28 = vsub.s32 1, %v2009_v1  ;;  %v1156_v52 = vsub.s32 2, %v2009_v1  ;;  %s1549_s3 = sshll.u32 %s1841_s2, 4  ;;  %s1550_s3 = int_to_ptr.vmem [resolvable:$true] %s1549_s3 }
 0x119   :  { %v386_v61 = vmul.f32 0.00390625, %v258_v59  ;;  %v838_v57 = vsel %vm594_vm12, %v837_v41, %v833_v35  ;;  %1620 = vmatpush3.msra.mxu1 %v932_v58  ;;  %v1223_v14 = vsub.s32 3, %v2009_v1  ;;  %v1675_v58 = vld [vmem:[#allocation2 + $0x70] sm:$0xff]  ;;  %s1809_s4 = scalar_lea.vmem %s1550_s3, 16384  ;;  %p1814_p9 = scmp.lt.s32.totalorder %s1550_s3, %s1550_s3 }
 0x11a   :  { %v768_v31 = vrot.slane %v401_v50, %v2345_v24  ;;  %v1022_v50 = vsub.s32 0, %v2009_v1  ;;  %p1810_p8 = scmp.ne.s32.totalorder %s1550_s3, %s1809_s4  ;;  %p1815_p10 = scmp.lt.s32.totalorder %s1809_s4, %s1809_s4 }
 0x11b   :  { %v306_v62 = vpop.xlane.xlu1 %305  ;;  %v694_v9 = vrot.slane %v386_v61, %v2107_v40 }
 0x11c   :  { %v402_v7 = vmul.f32 0.00390625, %v306_v62  ;;  %v348_v8 = vpop.xlane.xlu0 %347  ;;  %v769_v3 = vsel %vm608_vm14, %v768_v31, %v764_v21  ;;  %v1668_v21 = vld [vmem:[#allocation2 + $0x38] sm:$0xff]  ;;  %p1816_p11 = por %p1815_p10, %p1814_p9 }
 0x11d   :  { %v416_v36 = vmul.f32 0.00390625, %v348_v8  ;;  %v695_v42 = vsel %vm615_vm15, %v694_v9, %v690_v56  ;;  %v1663_v9 = vld [vmem:[#allocation2 + $0x20] sm:$0xff] }
 0x11e   :  { %v773_v54 = vrot.slane %v402_v7, %v2107_v40  ;;  %v855_v4 = vsel %vm854_vm0, %v695_v42, %v616_v5  ;;  %v1659_v7 = vld [vmem:[#allocation2 + $0x10] sm:$0xff]  ;;  %p1817_p12 = pnand %p1816_p11, %p1810_p8 }
 0x11f   :  { %v354_v19 = vpop.xlane.xlu1 %353  ;;  %v842_v17 = vrot.slane %v416_v36, %v2344_v48  ;;  %v1662_v36 = vld [vmem:[#allocation2 + $0x8] sm:$0xff] }
 0x120   :  { %v351_v33 = vpop.xlane.xlu0 %350  ;;  %v418_v25 = vmul.f32 0.00390625, %v354_v19  ;;  %v774_v12 = vsel %vm615_vm15, %v773_v54, %v769_v3  ;;  %v1665_v54 = vld [vmem:[#allocation2 + $0x40] sm:$0xff]  ;;  %v1670_v3 = vld [vmem:[#allocation2 + $0x68] sm:$0xff] }
 0x121   :  { %v417_v30 = vmul.f32 0.00390625, %v351_v33  ;;  %v843_v43 = vsel %vm601_vm13, %v842_v17, %v838_v57  ;;  %v1671_v57 = vld [vmem:[#allocation2 + $0x50] sm:$0xff] }
 0x122   :  { %v852_v29 = vrot.slane %v418_v25, %v2107_v40  ;;  %v857_v40 = vsel %vm856_vm1, %v774_v12, %v855_v4  ;;  %v1667_v25 = vld [vmem:[#allocation2 + $0x30] sm:$0xff]  ;;  %v1672_v12 = vld [vmem:[#allocation2 + $0x58] sm:$0xff]  ;;  %v1674_v4 = vld [vmem:[#allocation2 + $0x88] sm:$0xff] }
 0x123   :  { %v847_v34 = vrot.slane %v417_v30, %v2345_v24  ;;  %v1661_v24 = vld [vmem:[#allocation2] sm:$0xff] }
 0x124   :  { %v1669_v30 = vld [vmem:[#allocation2 + $0x60] sm:$0xff] }
 0x125   :  { %v848_v22 = vsel %vm608_vm14, %v847_v34, %v843_v43  ;;  %v1673_v43 = vld [vmem:[#allocation2 + $0x80] sm:$0xff] }
 0x126   :  { %v853_v38 = vsel %vm615_vm15, %v852_v29, %v848_v22 }
 0x127   :  { %v859_v63 = vsel %vm858_vm2, %v853_v38, %v857_v40 }
 0x128   :  { %1617 = vmatmul.mubr.f32.vlgmr.msra.gmra.mrb[0].mxu0 %v859_v63 }
 0x1fb   :  { %v927_v6 = vpop.f32.mrb[0].mxu0 }
 0x1fc   :  { %v928_v15 = vadd.f32 %v1561_v44, %v927_v6  ;;  %v1618_v39 = vpop.f32.mrb[1].mxu0  ;;  %v1676_v6 = vld [vmem:[#allocation2 + $0x78] sm:$0xff] }
 0x1fd   :  { %v1677_v39 = vld [vmem:[#allocation2 + $0xa0] sm:$0xff] }
 0x1fe   :  { %v931_v59 = vmax.f32 %v928_v15, 0.0 }
 0x200   :  { %1622 = vmatmul.mubr.msk.f32.vlgmr.msra.gmra.mrb[0].mxu1 %vm940_vm3, %v931_v59 }
 0x2d3   :  { %v1010_v45 = vpop.f32.mrb[0].mxu1 }
 0x2d4   :  { %v1011_v47 = vadd.f32 %v1562_v46, %v1010_v45  ;;  %v1623_v13 = vpop.f32.mrb[1].mxu1  ;;  %v1678_v46 = vld [vmem:[#allocation2 + $0xa8] sm:$0xff] }
 0x2d6   :  { %v1564_v48 = vmul.f32 -1.442695, %v1011_v47 }
 0x2d8   :  { %1655 = vpow2.f32 %v1564_v48  ;;  %v1679_v48 = vld [vmem:[#allocation2 + $0x90] sm:$0xff] }
 0x2e2   :  { %v1656_v20 = vpop.eup %1655 }
 0x2e3   :  { %v1017_v49 = vadd.f32 1.0, %v1656_v20 }
 0x2e5   :  { %1657 = vrcp.f32 %v1017_v49  ;;  %v1680_v49 = vld [vmem:[#allocation2 + $0x98] sm:$0xff] }
 0x2ef   :  { %v1658_v61 = vpop.eup %1657 }
 0x2f0   :  { %v1023_v18 = vrot.slane %v1658_v61, %v1022_v50  ;;  %v1090_v51 = vrot.slane %v1658_v61, %v1089_v28  ;;  %v1157_v62 = vrot.slane %v1658_v61, %v1156_v52  ;;  %v2286_v0 = vrot.slane %v1658_v61, %v1223_v14  ;;  %v1681_v61 = vld [vmem:[#allocation2 + $0xc0] sm:$0xff]  ;;  %v1682_v28 = vld [vmem:[#allocation2 + $0xc8] sm:$0xff]  ;;  %v1683_v14 = vld [vmem:[#allocation2 + $0xb0] sm:$0xff] }
 0x2f2   :  { %1029 = vbcast.lane.b32.xlu1 %v1023_v18, 264  ;;  %1025 = vbcast.lane.b32.xlu0 %v1023_v18, 256 }
 0x2f6   :  { %1033 = vbcast.lane.b32.xlu1 %v1023_v18, 272  ;;  %1041 = vbcast.lane.b32.xlu0 %v1023_v18, 288 }
 0x2fa   :  { %1037 = vbcast.lane.b32.xlu1 %v1023_v18, 280  ;;  %1049 = vbcast.lane.b32.xlu0 %v1023_v18, 304 }
 0x2fe   :  { %1045 = vbcast.lane.b32.xlu1 %v1023_v18, 296  ;;  %1057 = vbcast.lane.b32.xlu0 %v1023_v18, 320 }
 0x302   :  { %1053 = vbcast.lane.b32.xlu1 %v1023_v18, 312  ;;  %1065 = vbcast.lane.b32.xlu0 %v1023_v18, 336 }
 0x306   :  { %1061 = vbcast.lane.b32.xlu1 %v1023_v18, 328  ;;  %1073 = vbcast.lane.b32.xlu0 %v1023_v18, 352 }
 0x30a   :  { %1069 = vbcast.lane.b32.xlu1 %v1023_v18, 344  ;;  %1081 = vbcast.lane.b32.xlu0 %v1023_v18, 368 }
 0x30e   :  { %1077 = vbcast.lane.b32.xlu1 %v1023_v18, 360  ;;  %1092 = vbcast.lane.b32.xlu0 %v1090_v51, 256 }
 0x312   :  { %1085 = vbcast.lane.b32.xlu1 %v1023_v18, 376  ;;  %1100 = vbcast.lane.b32.xlu0 %v1090_v51, 272 }
 0x316   :  { %1096 = vbcast.lane.b32.xlu1 %v1090_v51, 264  ;;  %1108 = vbcast.lane.b32.xlu0 %v1090_v51, 288 }
 0x31a   :  { %1104 = vbcast.lane.b32.xlu1 %v1090_v51, 280  ;;  %1116 = vbcast.lane.b32.xlu0 %v1090_v51, 304 }
 0x31e   :  { %1112 = vbcast.lane.b32.xlu1 %v1090_v51, 296  ;;  %1124 = vbcast.lane.b32.xlu0 %v1090_v51, 320 }
 0x322   :  { %1120 = vbcast.lane.b32.xlu1 %v1090_v51, 312  ;;  %1132 = vbcast.lane.b32.xlu0 %v1090_v51, 336 }
 0x326   :  { %1128 = vbcast.lane.b32.xlu1 %v1090_v51, 328  ;;  %1140 = vbcast.lane.b32.xlu0 %v1090_v51, 352 }
 0x32a   :  { %1136 = vbcast.lane.b32.xlu1 %v1090_v51, 344  ;;  %1148 = vbcast.lane.b32.xlu0 %v1090_v51, 368 }
 0x32e   :  { %1144 = vbcast.lane.b32.xlu1 %v1090_v51, 360  ;;  %1159 = vbcast.lane.b32.xlu0 %v1157_v62, 256 }
 0x332   :  { %1152 = vbcast.lane.b32.xlu1 %v1090_v51, 376  ;;  %1167 = vbcast.lane.b32.xlu0 %v1157_v62, 272 }
 0x336   :  { %1163 = vbcast.lane.b32.xlu1 %v1157_v62, 264  ;;  %1175 = vbcast.lane.b32.xlu0 %v1157_v62, 288 }
 0x33a   :  { %1171 = vbcast.lane.b32.xlu1 %v1157_v62, 280  ;;  %1183 = vbcast.lane.b32.xlu0 %v1157_v62, 304 }
 0x33e   :  { %1179 = vbcast.lane.b32.xlu1 %v1157_v62, 296  ;;  %1191 = vbcast.lane.b32.xlu0 %v1157_v62, 320 }
 0x342   :  { %1187 = vbcast.lane.b32.xlu1 %v1157_v62, 312  ;;  %1199 = vbcast.lane.b32.xlu0 %v1157_v62, 336 }
 0x346   :  { %1195 = vbcast.lane.b32.xlu1 %v1157_v62, 328  ;;  %1207 = vbcast.lane.b32.xlu0 %v1157_v62, 352 }
 0x34a   :  { %1203 = vbcast.lane.b32.xlu1 %v1157_v62, 344  ;;  %1215 = vbcast.lane.b32.xlu0 %v1157_v62, 368 }
 0x34e   :  { %1211 = vbcast.lane.b32.xlu1 %v1157_v62, 360  ;;  %1226 = vbcast.lane.b32.xlu0 %v2286_v0, 256 }
 0x352   :  { %1219 = vbcast.lane.b32.xlu1 %v1157_v62, 376  ;;  %1234 = vbcast.lane.b32.xlu0 %v2286_v0, 272 }
 0x356   :  { %1230 = vbcast.lane.b32.xlu1 %v2286_v0, 264  ;;  %1242 = vbcast.lane.b32.xlu0 %v2286_v0, 288 }
 0x35a   :  { %1238 = vbcast.lane.b32.xlu1 %v2286_v0, 280  ;;  %1250 = vbcast.lane.b32.xlu0 %v2286_v0, 304 }
 0x35e   :  { %1246 = vbcast.lane.b32.xlu1 %v2286_v0, 296  ;;  %1258 = vbcast.lane.b32.xlu0 %v2286_v0, 320 }
 0x362   :  { %1254 = vbcast.lane.b32.xlu1 %v2286_v0, 312  ;;  %1266 = vbcast.lane.b32.xlu0 %v2286_v0, 336 }
 0x364   :  { %v1030_v1 = vpop.permute.xlu1 %1029  ;;  %v1026_v2 = vpop.permute.xlu0 %1025 }
 0x365   :  { %v1290_v8 = vmul.f32 %v1659_v7, %v1030_v1  ;;  %v1291_v11 = vmul.f32 %v1660_v10, %v1030_v1  ;;  %v1288_v53 = vmul.f32 %v1661_v24, %v1026_v2  ;;  %v1289_v23 = vmul.f32 %v1662_v36, %v1026_v2  ;;  %v1684_v1 = vld [vmem:[#allocation2 + $0xb8] sm:$0xff]  ;;  %v1685_v7 = vld [vmem:[#allocation2 + $0xe0] sm:$0xff]  ;;  %v1686_v10 = vld [vmem:[#allocation2 + $0xe8] sm:$0xff] }
 0x366   :  { %1262 = vbcast.lane.b32.xlu1 %v2286_v0, 328  ;;  %1274 = vbcast.lane.b32.xlu0 %v2286_v0, 352  ;;  %v1687_v36 = vld [vmem:[#allocation2 + $0xd0] sm:$0xff] }
 0x367   :  { %1418 = vst [vmem:[#allocation5 + $0x10] sm:$0xff] %v1290_v8  ;;  %1419 = vst [vmem:[#allocation5 + $0x18] sm:$0xff] %v1291_v11 }
 0x368   :  { %1416 = vst [vmem:[#allocation5] sm:$0xff] %v1288_v53  ;;  %1417 = vst [vmem:[#allocation5 + $0x8] sm:$0xff] %v1289_v23  ;;  %v1034_v37 = vpop.permute.xlu1 %1033  ;;  %v1042_v31 = vpop.permute.xlu0 %1041 }
 0x369   :  { %v1292_v32 = vmul.f32 %v1663_v9, %v1034_v37  ;;  %v1293_v41 = vmul.f32 %v1664_v55, %v1034_v37  ;;  %v1296_v19 = vmul.f32 %v1665_v54, %v1042_v31  ;;  %v1297_v26 = vmul.f32 %v1666_v60, %v1042_v31  ;;  %v1688_v37 = vld [vmem:[#allocation2 + $0xd8] sm:$0xff]  ;;  %v1689_v9 = vld [vmem:[#allocation2 + $0x100] sm:$0xff]  ;;  %v1690_v55 = vld [vmem:[#allocation2 + $0x108] sm:$0xff] }
 0x36a   :  { %1270 = vbcast.lane.b32.xlu1 %v2286_v0, 344  ;;  %1282 = vbcast.lane.b32.xlu0 %v2286_v0, 368  ;;  %v1691_v60 = vld [vmem:[#allocation2 + $0xf0] sm:$0xff] }
 0x36b   :  { %1420 = vst [vmem:[#allocation5 + $0x20] sm:$0xff] %v1292_v32  ;;  %1421 = vst [vmem:[#allocation5 + $0x28] sm:$0xff] %v1293_v41 }
 0x36c   :  { %1424 = vst [vmem:[#allocation5 + $0x40] sm:$0xff] %v1296_v19  ;;  %1425 = vst [vmem:[#allocation5 + $0x48] sm:$0xff] %v1297_v26  ;;  %v1038_v17 = vpop.permute.xlu1 %1037  ;;  %v1050_v33 = vpop.permute.xlu0 %1049 }
 0x36d   :  { %v1294_v16 = vmul.f32 %v1667_v25, %v1038_v17  ;;  %v1295_v56 = vmul.f32 %v1668_v21, %v1038_v17  ;;  %v1300_v35 = vmul.f32 %v1669_v30, %v1050_v33  ;;  %v1301_v42 = vmul.f32 %v1670_v3, %v1050_v33  ;;  %v1692_v17 = vld [vmem:[#allocation2 + $0xf8] sm:$0xff]  ;;  %v1693_v25 = vld [vmem:[#allocation2 + $0x120] sm:$0xff]  ;;  %v1694_v21 = vld [vmem:[#allocation2 + $0x128] sm:$0xff] }
 0x36e   :  { %1278 = vbcast.lane.b32.xlu1 %v2286_v0, 360  ;;  %v1695_v3 = vld [vmem:[#allocation2 + $0x110] sm:$0xff] }
 0x36f   :  { %1422 = vst [vmem:[#allocation5 + $0x30] sm:$0xff] %v1294_v16  ;;  %1423 = vst [vmem:[#allocation5 + $0x38] sm:$0xff] %v1295_v56 }
 0x370   :  { %1428 = vst [vmem:[#allocation5 + $0x60] sm:$0xff] %v1300_v35  ;;  %1429 = vst [vmem:[#allocation5 + $0x68] sm:$0xff] %v1301_v42  ;;  %v1046_v29 = vpop.permute.xlu1 %1045  ;;  %v1058_v27 = vpop.permute.xlu0 %1057 }
 0x371   :  { %v1298_v34 = vmul.f32 %v1671_v57, %v1046_v29  ;;  %v1299_v5 = vmul.f32 %v1672_v12, %v1046_v29  ;;  %v1304_v22 = vmul.f32 %v1673_v43, %v1058_v27  ;;  %v1305_v38 = vmul.f32 %v1674_v4, %v1058_v27  ;;  %v1696_v29 = vld [vmem:[#allocation2 + $0x118] sm:$0xff]  ;;  %v1697_v57 = vld [vmem:[#allocation2 + $0x140] sm:$0xff]  ;;  %v1698_v12 = vld [vmem:[#allocation2 + $0x148] sm:$0xff] }
 0x372   :  { %1286 = vbcast.lane.b32.xlu1 %v2286_v0, 376  ;;  %v1699_v4 = vld [vmem:[#allocation2 + $0x130] sm:$0xff] }
 0x373   :  { %1426 = vst [vmem:[#allocation5 + $0x50] sm:$0xff] %v1298_v34  ;;  %1427 = vst [vmem:[#allocation5 + $0x58] sm:$0xff] %v1299_v5 }
 0x374   :  { %1432 = vst [vmem:[#allocation5 + $0x80] sm:$0xff] %v1304_v22  ;;  %1433 = vst [vmem:[#allocation5 + $0x88] sm:$0xff] %v1305_v38  ;;  %v1054_v40 = vpop.permute.xlu1 %1053  ;;  %v1066_v63 = vpop.permute.xlu0 %1065 }
 0x375   :  { %v1302_v44 = vmul.f32 %v1675_v58, %v1054_v40  ;;  %v1303_v15 = vmul.f32 %v1676_v6, %v1054_v40  ;;  %v1308_v59 = vmul.f32 %v1677_v39, %v1066_v63  ;;  %v1309_v45 = vmul.f32 %v1678_v46, %v1066_v63  ;;  %v1700_v40 = vld [vmem:[#allocation2 + $0x138] sm:$0xff]  ;;  %v1701_v58 = vld [vmem:[#allocation2 + $0x160] sm:$0xff]  ;;  %v1702_v6 = vld [vmem:[#allocation2 + $0x168] sm:$0xff] }
 0x376   :  { %v1703_v46 = vld [vmem:[#allocation2 + $0x150] sm:$0xff] }
 0x377   :  { %1430 = vst [vmem:[#allocation5 + $0x70] sm:$0xff] %v1302_v44  ;;  %1431 = vst [vmem:[#allocation5 + $0x78] sm:$0xff] %v1303_v15 }
 0x378   :  { %1436 = vst [vmem:[#allocation5 + $0xa0] sm:$0xff] %v1308_v59  ;;  %1437 = vst [vmem:[#allocation5 + $0xa8] sm:$0xff] %v1309_v45  ;;  %v1062_v47 = vpop.permute.xlu1 %1061  ;;  %v1074_v13 = vpop.permute.xlu0 %1073 }
 0x379   :  { %v1306_v20 = vmul.f32 %v1679_v48, %v1062_v47  ;;  %v1307_v50 = vmul.f32 %v1680_v49, %v1062_v47  ;;  %v1312_v18 = vmul.f32 %v1681_v61, %v1074_v13  ;;  %v1313_v51 = vmul.f32 %v1682_v28, %v1074_v13  ;;  %v1704_v47 = vld [vmem:[#allocation2 + $0x158] sm:$0xff]  ;;  %v1705_v48 = vld [vmem:[#allocation2 + $0x180] sm:$0xff]  ;;  %v1706_v49 = vld [vmem:[#allocation2 + $0x188] sm:$0xff] }
 0x37a   :  { %v1707_v28 = vld [vmem:[#allocation2 + $0x170] sm:$0xff] }
 0x37b   :  { %1434 = vst [vmem:[#allocation5 + $0x90] sm:$0xff] %v1306_v20  ;;  %1435 = vst [vmem:[#allocation5 + $0x98] sm:$0xff] %v1307_v50 }
 0x37c   :  { %1440 = vst [vmem:[#allocation5 + $0xc0] sm:$0xff] %v1312_v18  ;;  %1441 = vst [vmem:[#allocation5 + $0xc8] sm:$0xff] %v1313_v51  ;;  %v1070_v52 = vpop.permute.xlu1 %1069  ;;  %v1082_v62 = vpop.permute.xlu0 %1081 }
 0x37d   :  { %v1310_v0 = vmul.f32 %v1683_v14, %v1070_v52  ;;  %v1311_v2 = vmul.f32 %v1684_v1, %v1070_v52  ;;  %v1316_v8 = vmul.f32 %v1685_v7, %v1082_v62  ;;  %v1317_v11 = vmul.f32 %v1686_v10, %v1082_v62  ;;  %v1708_v52 = vld [vmem:[#allocation2 + $0x178] sm:$0xff]  ;;  %v1709_v14 = vld [vmem:[#allocation2 + $0x1a0] sm:$0xff]  ;;  %v1710_v1 = vld [vmem:[#allocation2 + $0x1a8] sm:$0xff] }
 0x37e   :  { %v1711_v10 = vld [vmem:[#allocation2 + $0x190] sm:$0xff] }
 0x37f   :  { %1438 = vst [vmem:[#allocation5 + $0xb0] sm:$0xff] %v1310_v0  ;;  %1439 = vst [vmem:[#allocation5 + $0xb8] sm:$0xff] %v1311_v2 }
 0x380   :  { %1444 = vst [vmem:[#allocation5 + $0xe0] sm:$0xff] %v1316_v8  ;;  %1445 = vst [vmem:[#allocation5 + $0xe8] sm:$0xff] %v1317_v11  ;;  %v1078_v24 = vpop.permute.xlu1 %1077  ;;  %v1093_v53 = vpop.permute.xlu0 %1092 }
 0x381   :  { %v1314_v23 = vmul.f32 %v1687_v36, %v1078_v24  ;;  %v1315_v31 = vmul.f32 %v1688_v37, %v1078_v24  ;;  %v1320_v32 = vmul.f32 %v1689_v9, %v1093_v53  ;;  %v1321_v41 = vmul.f32 %v1690_v55, %v1093_v53  ;;  %v1712_v24 = vld [vmem:[#allocation2 + $0x198] sm:$0xff]  ;;  %v1713_v36 = vld [vmem:[#allocation2 + $0x1c0] sm:$0xff]  ;;  %v1714_v37 = vld [vmem:[#allocation2 + $0x1c8] sm:$0xff] }
 0x382   :  { %v1715_v55 = vld [vmem:[#allocation2 + $0x1b0] sm:$0xff] }
 0x383   :  { %1442 = vst [vmem:[#allocation5 + $0xd0] sm:$0xff] %v1314_v23  ;;  %1443 = vst [vmem:[#allocation5 + $0xd8] sm:$0xff] %v1315_v31 }
 0x384   :  { %1448 = vst [vmem:[#allocation5 + $0x100] sm:$0xff] %v1320_v32  ;;  %1449 = vst [vmem:[#allocation5 + $0x108] sm:$0xff] %v1321_v41  ;;  %v1086_v54 = vpop.permute.xlu1 %1085  ;;  %v1101_v19 = vpop.permute.xlu0 %1100 }
 0x385   :  { %v1318_v26 = vmul.f32 %v1691_v60, %v1086_v54  ;;  %v1319_v33 = vmul.f32 %v1692_v17, %v1086_v54  ;;  %v1324_v16 = vmul.f32 %v1693_v25, %v1101_v19  ;;  %v1325_v56 = vmul.f32 %v1694_v21, %v1101_v19  ;;  %v1716_v54 = vld [vmem:[#allocation2 + $0x1b8] sm:$0xff]  ;;  %v1717_v60 = vld [vmem:[#allocation2 + $0x1e0] sm:$0xff]  ;;  %v1718_v17 = vld [vmem:[#allocation2 + $0x1e8] sm:$0xff] }
 0x386   :  { %v1719_v21 = vld [vmem:[#allocation2 + $0x1d0] sm:$0xff] }
 0x387   :  { %1446 = vst [vmem:[#allocation5 + $0xf0] sm:$0xff] %v1318_v26  ;;  %1447 = vst [vmem:[#allocation5 + $0xf8] sm:$0xff] %v1319_v33 }
 0x388   :  { %1452 = vst [vmem:[#allocation5 + $0x120] sm:$0xff] %v1324_v16  ;;  %1453 = vst [vmem:[#allocation5 + $0x128] sm:$0xff] %v1325_v56  ;;  %v1097_v30 = vpop.permute.xlu1 %1096  ;;  %v1109_v35 = vpop.permute.xlu0 %1108 }
 0x389   :  { %v1322_v42 = vmul.f32 %v1695_v3, %v1097_v30  ;;  %v1323_v27 = vmul.f32 %v1696_v29, %v1097_v30  ;;  %v1328_v34 = vmul.f32 %v1697_v57, %v1109_v35  ;;  %v1329_v5 = vmul.f32 %v1698_v12, %v1109_v35  ;;  %v1720_v30 = vld [vmem:[#allocation2 + $0x1d8] sm:$0xff]  ;;  %v1721_v3 = vld [vmem:[#allocation2 + $0x200] sm:$0xff]  ;;  %v1722_v29 = vld [vmem:[#allocation2 + $0x208] sm:$0xff] }
 0x38a   :  { %v1723_v12 = vld [vmem:[#allocation2 + $0x1f0] sm:$0xff] }
 0x38b   :  { %1450 = vst [vmem:[#allocation5 + $0x110] sm:$0xff] %v1322_v42  ;;  %1451 = vst [vmem:[#allocation5 + $0x118] sm:$0xff] %v1323_v27 }
 0x38c   :  { %1456 = vst [vmem:[#allocation5 + $0x140] sm:$0xff] %v1328_v34  ;;  %1457 = vst [vmem:[#allocation5 + $0x148] sm:$0xff] %v1329_v5  ;;  %v1105_v43 = vpop.permute.xlu1 %1104  ;;  %v1117_v22 = vpop.permute.xlu0 %1116 }
 0x38d   :  { %v1326_v38 = vmul.f32 %v1699_v4, %v1105_v43  ;;  %v1327_v63 = vmul.f32 %v1700_v40, %v1105_v43  ;;  %v1332_v44 = vmul.f32 %v1701_v58, %v1117_v22  ;;  %v1333_v15 = vmul.f32 %v1702_v6, %v1117_v22  ;;  %v1724_v43 = vld [vmem:[#allocation2 + $0x1f8] sm:$0xff]  ;;  %v1725_v4 = vld [vmem:[#allocation2 + $0x220] sm:$0xff]  ;;  %v1726_v40 = vld [vmem:[#allocation2 + $0x228] sm:$0xff] }
 0x38e   :  { %v1727_v6 = vld [vmem:[#allocation2 + $0x210] sm:$0xff] }
 0x38f   :  { %1454 = vst [vmem:[#allocation5 + $0x130] sm:$0xff] %v1326_v38  ;;  %1455 = vst [vmem:[#allocation5 + $0x138] sm:$0xff] %v1327_v63 }
 0x390   :  { %1460 = vst [vmem:[#allocation5 + $0x160] sm:$0xff] %v1332_v44  ;;  %1461 = vst [vmem:[#allocation5 + $0x168] sm:$0xff] %v1333_v15  ;;  %v1113_v39 = vpop.permute.xlu1 %1112  ;;  %v1125_v59 = vpop.permute.xlu0 %1124 }
 0x391   :  { %v1330_v45 = vmul.f32 %v1703_v46, %v1113_v39  ;;  %v1331_v13 = vmul.f32 %v1704_v47, %v1113_v39  ;;  %v1336_v20 = vmul.f32 %v1705_v48, %v1125_v59  ;;  %v1337_v50 = vmul.f32 %v1706_v49, %v1125_v59  ;;  %v1728_v39 = vld [vmem:[#allocation2 + $0x218] sm:$0xff]  ;;  %v1729_v46 = vld [vmem:[#allocation2 + $0x240] sm:$0xff]  ;;  %v1730_v47 = vld [vmem:[#allocation2 + $0x248] sm:$0xff] }
 0x392   :  { %v1731_v49 = vld [vmem:[#allocation2 + $0x230] sm:$0xff] }
 0x393   :  { %1458 = vst [vmem:[#allocation5 + $0x150] sm:$0xff] %v1330_v45  ;;  %1459 = vst [vmem:[#allocation5 + $0x158] sm:$0xff] %v1331_v13 }
 0x394   :  { %1464 = vst [vmem:[#allocation5 + $0x180] sm:$0xff] %v1336_v20  ;;  %1465 = vst [vmem:[#allocation5 + $0x188] sm:$0xff] %v1337_v50  ;;  %v1121_v61 = vpop.permute.xlu1 %1120  ;;  %v1133_v18 = vpop.permute.xlu0 %1132 }
 0x395   :  { %v1334_v51 = vmul.f32 %v1707_v28, %v1121_v61  ;;  %v1335_v62 = vmul.f32 %v1708_v52, %v1121_v61  ;;  %v1340_v0 = vmul.f32 %v1709_v14, %v1133_v18  ;;  %v1341_v2 = vmul.f32 %v1710_v1, %v1133_v18  ;;  %v1732_v61 = vld [vmem:[#allocation2 + $0x238] sm:$0xff]  ;;  %v1733_v28 = vld [vmem:[#allocation2 + $0x260] sm:$0xff]  ;;  %v1734_v52 = vld [vmem:[#allocation2 + $0x268] sm:$0xff] }
 0x396   :  { %v1735_v1 = vld [vmem:[#allocation2 + $0x250] sm:$0xff] }
 0x397   :  { %1462 = vst [vmem:[#allocation5 + $0x170] sm:$0xff] %v1334_v51  ;;  %1463 = vst [vmem:[#allocation5 + $0x178] sm:$0xff] %v1335_v62 }
 0x398   :  { %1468 = vst [vmem:[#allocation5 + $0x1a0] sm:$0xff] %v1340_v0  ;;  %1469 = vst [vmem:[#allocation5 + $0x1a8] sm:$0xff] %v1341_v2  ;;  %v1129_v7 = vpop.permute.xlu1 %1128  ;;  %v1141_v8 = vpop.permute.xlu0 %1140 }
 0x399   :  { %v1338_v11 = vmul.f32 %v1711_v10, %v1129_v7  ;;  %v1339_v53 = vmul.f32 %v1712_v24, %v1129_v7  ;;  %v1344_v23 = vmul.f32 %v1713_v36, %v1141_v8  ;;  %v1345_v31 = vmul.f32 %v1714_v37, %v1141_v8  ;;  %v1736_v7 = vld [vmem:[#allocation2 + $0x258] sm:$0xff]  ;;  %v1737_v10 = vld [vmem:[#allocation2 + $0x280] sm:$0xff]  ;;  %v1738_v24 = vld [vmem:[#allocation2 + $0x288] sm:$0xff] }
 0x39a   :  { %v1739_v37 = vld [vmem:[#allocation2 + $0x270] sm:$0xff] }
 0x39b   :  { %1466 = vst [vmem:[#allocation5 + $0x190] sm:$0xff] %v1338_v11  ;;  %1467 = vst [vmem:[#allocation5 + $0x198] sm:$0xff] %v1339_v53 }
 0x39c   :  { %1472 = vst [vmem:[#allocation5 + $0x1c0] sm:$0xff] %v1344_v23  ;;  %1473 = vst [vmem:[#allocation5 + $0x1c8] sm:$0xff] %v1345_v31  ;;  %v1137_v9 = vpop.permute.xlu1 %1136  ;;  %v1149_v32 = vpop.permute.xlu0 %1148 }
 0x39d   :  { %v1342_v41 = vmul.f32 %v1715_v55, %v1137_v9  ;;  %v1343_v19 = vmul.f32 %v1716_v54, %v1137_v9  ;;  %v1348_v26 = vmul.f32 %v1717_v60, %v1149_v32  ;;  %v1349_v33 = vmul.f32 %v1718_v17, %v1149_v32  ;;  %v1740_v9 = vld [vmem:[#allocation2 + $0x278] sm:$0xff]  ;;  %v1741_v55 = vld [vmem:[#allocation2 + $0x2a0] sm:$0xff]  ;;  %v1742_v54 = vld [vmem:[#allocation2 + $0x2a8] sm:$0xff] }
 0x39e   :  { %v1743_v17 = vld [vmem:[#allocation2 + $0x290] sm:$0xff] }
 0x39f   :  { %1470 = vst [vmem:[#allocation5 + $0x1b0] sm:$0xff] %v1342_v41  ;;  %1471 = vst [vmem:[#allocation5 + $0x1b8] sm:$0xff] %v1343_v19 }
 0x3a0   :  { %1476 = vst [vmem:[#allocation5 + $0x1e0] sm:$0xff] %v1348_v26  ;;  %1477 = vst [vmem:[#allocation5 + $0x1e8] sm:$0xff] %v1349_v33  ;;  %v1145_v25 = vpop.permute.xlu1 %1144  ;;  %v1160_v16 = vpop.permute.xlu0 %1159 }
 0x3a1   :  { %v1346_v56 = vmul.f32 %v1719_v21, %v1145_v25  ;;  %v1347_v35 = vmul.f32 %v1720_v30, %v1145_v25  ;;  %v1352_v42 = vmul.f32 %v1721_v3, %v1160_v16  ;;  %v1353_v27 = vmul.f32 %v1722_v29, %v1160_v16  ;;  %v1744_v25 = vld [vmem:[#allocation2 + $0x298] sm:$0xff]  ;;  %v1745_v21 = vld [vmem:[#allocation2 + $0x2c0] sm:$0xff]  ;;  %v1746_v30 = vld [vmem:[#allocation2 + $0x2c8] sm:$0xff] }
 0x3a2   :  { %v1747_v29 = vld [vmem:[#allocation2 + $0x2b0] sm:$0xff] }
 0x3a3   :  { %1474 = vst [vmem:[#allocation5 + $0x1d0] sm:$0xff] %v1346_v56  ;;  %1475 = vst [vmem:[#allocation5 + $0x1d8] sm:$0xff] %v1347_v35 }
 0x3a4   :  { %1480 = vst [vmem:[#allocation5 + $0x200] sm:$0xff] %v1352_v42  ;;  %1481 = vst [vmem:[#allocation5 + $0x208] sm:$0xff] %v1353_v27  ;;  %v1153_v57 = vpop.permute.xlu1 %1152  ;;  %v1168_v34 = vpop.permute.xlu0 %1167 }
 0x3a5   :  { %v1350_v5 = vmul.f32 %v1723_v12, %v1153_v57  ;;  %v1351_v22 = vmul.f32 %v1724_v43, %v1153_v57  ;;  %v1356_v38 = vmul.f32 %v1725_v4, %v1168_v34  ;;  %v1357_v63 = vmul.f32 %v1726_v40, %v1168_v34  ;;  %v1748_v57 = vld [vmem:[#allocation2 + $0x2b8] sm:$0xff]  ;;  %v1749_v12 = vld [vmem:[#allocation2 + $0x2e0] sm:$0xff]  ;;  %v1750_v43 = vld [vmem:[#allocation2 + $0x2e8] sm:$0xff] }
 0x3a6   :  { %v1751_v40 = vld [vmem:[#allocation2 + $0x2d0] sm:$0xff] }
 0x3a7   :  { %1478 = vst [vmem:[#allocation5 + $0x1f0] sm:$0xff] %v1350_v5  ;;  %1479 = vst [vmem:[#allocation5 + $0x1f8] sm:$0xff] %v1351_v22 }
 0x3a8   :  { %1484 = vst [vmem:[#allocation5 + $0x220] sm:$0xff] %v1356_v38  ;;  %1485 = vst [vmem:[#allocation5 + $0x228] sm:$0xff] %v1357_v63  ;;  %v1164_v58 = vpop.permute.xlu1 %1163  ;;  %v1176_v44 = vpop.permute.xlu0 %1175 }
 0x3a9   :  { %v1354_v15 = vmul.f32 %v1727_v6, %v1164_v58  ;;  %v1355_v59 = vmul.f32 %v1728_v39, %v1164_v58  ;;  %v1360_v45 = vmul.f32 %v1729_v46, %v1176_v44  ;;  %v1361_v13 = vmul.f32 %v1730_v47, %v1176_v44  ;;  %v1752_v58 = vld [vmem:[#allocation2 + $0x2d8] sm:$0xff]  ;;  %v1753_v6 = vld [vmem:[#allocation2 + $0x300] sm:$0xff]  ;;  %v1754_v39 = vld [vmem:[#allocation2 + $0x308] sm:$0xff] }
 0x3aa   :  { %v1755_v47 = vld [vmem:[#allocation2 + $0x2f0] sm:$0xff] }
 0x3ab   :  { %1482 = vst [vmem:[#allocation5 + $0x210] sm:$0xff] %v1354_v15  ;;  %1483 = vst [vmem:[#allocation5 + $0x218] sm:$0xff] %v1355_v59 }
 0x3ac   :  { %1488 = vst [vmem:[#allocation5 + $0x240] sm:$0xff] %v1360_v45  ;;  %1489 = vst [vmem:[#allocation5 + $0x248] sm:$0xff] %v1361_v13  ;;  %v1172_v48 = vpop.permute.xlu1 %1171  ;;  %v1184_v20 = vpop.permute.xlu0 %1183 }
 0x3ad   :  { %v1358_v50 = vmul.f32 %v1731_v49, %v1172_v48  ;;  %v1359_v18 = vmul.f32 %v1732_v61, %v1172_v48  ;;  %v1364_v51 = vmul.f32 %v1733_v28, %v1184_v20  ;;  %v1365_v62 = vmul.f32 %v1734_v52, %v1184_v20  ;;  %v1756_v48 = vld [vmem:[#allocation2 + $0x2f8] sm:$0xff]  ;;  %v1757_v49 = vld [vmem:[#allocation2 + $0x320] sm:$0xff]  ;;  %v1758_v61 = vld [vmem:[#allocation2 + $0x328] sm:$0xff] }
 0x3ae   :  { %v1759_v52 = vld [vmem:[#allocation2 + $0x310] sm:$0xff] }
 0x3af   :  { %1486 = vst [vmem:[#allocation5 + $0x230] sm:$0xff] %v1358_v50  ;;  %1487 = vst [vmem:[#allocation5 + $0x238] sm:$0xff] %v1359_v18 }
 0x3b0   :  { %1492 = vst [vmem:[#allocation5 + $0x260] sm:$0xff] %v1364_v51  ;;  %1493 = vst [vmem:[#allocation5 + $0x268] sm:$0xff] %v1365_v62  ;;  %v1180_v14 = vpop.permute.xlu1 %1179  ;;  %v1192_v0 = vpop.permute.xlu0 %1191 }
 0x3b1   :  { %v1362_v2 = vmul.f32 %v1735_v1, %v1180_v14  ;;  %v1363_v8 = vmul.f32 %v1736_v7, %v1180_v14  ;;  %v1368_v11 = vmul.f32 %v1737_v10, %v1192_v0  ;;  %v1369_v53 = vmul.f32 %v1738_v24, %v1192_v0  ;;  %v1760_v14 = vld [vmem:[#allocation2 + $0x318] sm:$0xff]  ;;  %v1761_v1 = vld [vmem:[#allocation2 + $0x340] sm:$0xff]  ;;  %v1762_v7 = vld [vmem:[#allocation2 + $0x348] sm:$0xff] }
 0x3b2   :  { %v1763_v24 = vld [vmem:[#allocation2 + $0x330] sm:$0xff] }
 0x3b3   :  { %1490 = vst [vmem:[#allocation5 + $0x250] sm:$0xff] %v1362_v2  ;;  %1491 = vst [vmem:[#allocation5 + $0x258] sm:$0xff] %v1363_v8 }
 0x3b4   :  { %1496 = vst [vmem:[#allocation5 + $0x280] sm:$0xff] %v1368_v11  ;;  %1497 = vst [vmem:[#allocation5 + $0x288] sm:$0xff] %v1369_v53  ;;  %v1188_v36 = vpop.permute.xlu1 %1187  ;;  %v1200_v23 = vpop.permute.xlu0 %1199 }
 0x3b5   :  { %v1366_v31 = vmul.f32 %v1739_v37, %v1188_v36  ;;  %v1367_v32 = vmul.f32 %v1740_v9, %v1188_v36  ;;  %v1372_v41 = vmul.f32 %v1741_v55, %v1200_v23  ;;  %v1373_v19 = vmul.f32 %v1742_v54, %v1200_v23  ;;  %v1764_v36 = vld [vmem:[#allocation2 + $0x338] sm:$0xff]  ;;  %v1765_v37 = vld [vmem:[#allocation2 + $0x360] sm:$0xff]  ;;  %v1766_v9 = vld [vmem:[#allocation2 + $0x368] sm:$0xff] }
 0x3b6   :  { %v1767_v54 = vld [vmem:[#allocation2 + $0x350] sm:$0xff] }
 0x3b7   :  { %1494 = vst [vmem:[#allocation5 + $0x270] sm:$0xff] %v1366_v31  ;;  %1495 = vst [vmem:[#allocation5 + $0x278] sm:$0xff] %v1367_v32 }
 0x3b8   :  { %1500 = vst [vmem:[#allocation5 + $0x2a0] sm:$0xff] %v1372_v41  ;;  %1501 = vst [vmem:[#allocation5 + $0x2a8] sm:$0xff] %v1373_v19  ;;  %v1196_v60 = vpop.permute.xlu1 %1195  ;;  %v1208_v26 = vpop.permute.xlu0 %1207 }
 0x3b9   :  { %v1370_v33 = vmul.f32 %v1743_v17, %v1196_v60  ;;  %v1371_v16 = vmul.f32 %v1744_v25, %v1196_v60  ;;  %v1376_v56 = vmul.f32 %v1745_v21, %v1208_v26  ;;  %v1377_v35 = vmul.f32 %v1746_v30, %v1208_v26  ;;  %v1768_v60 = vld [vmem:[#allocation2 + $0x358] sm:$0xff]  ;;  %v1769_v17 = vld [vmem:[#allocation2 + $0x380] sm:$0xff]  ;;  %v1770_v25 = vld [vmem:[#allocation2 + $0x388] sm:$0xff] }
 0x3ba   :  { %v1771_v30 = vld [vmem:[#allocation2 + $0x370] sm:$0xff] }
 0x3bb   :  { %1498 = vst [vmem:[#allocation5 + $0x290] sm:$0xff] %v1370_v33  ;;  %1499 = vst [vmem:[#allocation5 + $0x298] sm:$0xff] %v1371_v16 }
 0x3bc   :  { %1504 = vst [vmem:[#allocation5 + $0x2c0] sm:$0xff] %v1376_v56  ;;  %1505 = vst [vmem:[#allocation5 + $0x2c8] sm:$0xff] %v1377_v35  ;;  %v1204_v3 = vpop.permute.xlu1 %1203  ;;  %v1216_v42 = vpop.permute.xlu0 %1215 }
 0x3bd   :  { %v1374_v27 = vmul.f32 %v1747_v29, %v1204_v3  ;;  %v1375_v34 = vmul.f32 %v1748_v57, %v1204_v3  ;;  %v1380_v5 = vmul.f32 %v1749_v12, %v1216_v42  ;;  %v1381_v22 = vmul.f32 %v1750_v43, %v1216_v42  ;;  %v1772_v3 = vld [vmem:[#allocation2 + $0x378] sm:$0xff]  ;;  %v1773_v29 = vld [vmem:[#allocation2 + $0x3a0] sm:$0xff]  ;;  %v1774_v57 = vld [vmem:[#allocation2 + $0x3a8] sm:$0xff] }
 0x3be   :  { %v1775_v43 = vld [vmem:[#allocation2 + $0x390] sm:$0xff] }
 0x3bf   :  { %1502 = vst [vmem:[#allocation5 + $0x2b0] sm:$0xff] %v1374_v27  ;;  %1503 = vst [vmem:[#allocation5 + $0x2b8] sm:$0xff] %v1375_v34 }
 0x3c0   :  { %1508 = vst [vmem:[#allocation5 + $0x2e0] sm:$0xff] %v1380_v5  ;;  %1509 = vst [vmem:[#allocation5 + $0x2e8] sm:$0xff] %v1381_v22  ;;  %v1212_v4 = vpop.permute.xlu1 %1211  ;;  %v1227_v38 = vpop.permute.xlu0 %1226 }
 0x3c1   :  { %v1378_v63 = vmul.f32 %v1751_v40, %v1212_v4  ;;  %v1379_v44 = vmul.f32 %v1752_v58, %v1212_v4  ;;  %v1384_v15 = vmul.f32 %v1753_v6, %v1227_v38  ;;  %v1385_v59 = vmul.f32 %v1754_v39, %v1227_v38  ;;  %v1776_v4 = vld [vmem:[#allocation2 + $0x398] sm:$0xff]  ;;  %v1777_v40 = vld [vmem:[#allocation2 + $0x3c0] sm:$0xff]  ;;  %v1778_v58 = vld [vmem:[#allocation2 + $0x3c8] sm:$0xff] }
 0x3c2   :  { %v1779_v39 = vld [vmem:[#allocation2 + $0x3b0] sm:$0xff] }
 0x3c3   :  { %1506 = vst [vmem:[#allocation5 + $0x2d0] sm:$0xff] %v1378_v63  ;;  %1507 = vst [vmem:[#allocation5 + $0x2d8] sm:$0xff] %v1379_v44 }
 0x3c4   :  { %1512 = vst [vmem:[#allocation5 + $0x300] sm:$0xff] %v1384_v15  ;;  %1513 = vst [vmem:[#allocation5 + $0x308] sm:$0xff] %v1385_v59  ;;  %v1220_v46 = vpop.permute.xlu1 %1219  ;;  %v1235_v45 = vpop.permute.xlu0 %1234 }
 0x3c5   :  { %v1382_v13 = vmul.f32 %v1755_v47, %v1220_v46  ;;  %v1383_v20 = vmul.f32 %v1756_v48, %v1220_v46  ;;  %v1388_v50 = vmul.f32 %v1757_v49, %v1235_v45  ;;  %v1389_v18 = vmul.f32 %v1758_v61, %v1235_v45  ;;  %v1780_v46 = vld [vmem:[#allocation2 + $0x3b8] sm:$0xff]  ;;  %v1781_v47 = vld [vmem:[#allocation2 + $0x3e0] sm:$0xff]  ;;  %v1782_v48 = vld [vmem:[#allocation2 + $0x3e8] sm:$0xff] }
 0x3c7   :  { %1510 = vst [vmem:[#allocation5 + $0x2f0] sm:$0xff] %v1382_v13  ;;  %1511 = vst [vmem:[#allocation5 + $0x2f8] sm:$0xff] %v1383_v20 }
 0x3c8   :  { %1516 = vst [vmem:[#allocation5 + $0x320] sm:$0xff] %v1388_v50  ;;  %1517 = vst [vmem:[#allocation5 + $0x328] sm:$0xff] %v1389_v18  ;;  %v1231_v28 = vpop.permute.xlu1 %1230  ;;  %v1243_v51 = vpop.permute.xlu0 %1242  ;;  %v1783_v50 = vld [vmem:[#allocation2 + $0x3d0] sm:$0xff]  ;;  %v1784_v18 = vld [vmem:[#allocation2 + $0x3d8] sm:$0xff] }
 0x3c9   :  { %v1386_v62 = vmul.f32 %v1759_v52, %v1231_v28  ;;  %v1387_v0 = vmul.f32 %v1760_v14, %v1231_v28  ;;  %v1392_v2 = vmul.f32 %v1761_v1, %v1243_v51  ;;  %v1393_v8 = vmul.f32 %v1762_v7, %v1243_v51  ;;  %v1785_v52 = vld [vmem:[#allocation2 + $0x3f0] sm:$0xff]  ;;  %v1786_v14 = vld [vmem:[#allocation2 + $0x3f8] sm:$0xff] }
 0x3cb   :  { %1514 = vst [vmem:[#allocation5 + $0x310] sm:$0xff] %v1386_v62  ;;  %1515 = vst [vmem:[#allocation5 + $0x318] sm:$0xff] %v1387_v0 }
 0x3cc   :  { %1520 = vst [vmem:[#allocation5 + $0x340] sm:$0xff] %v1392_v2  ;;  %1521 = vst [vmem:[#allocation5 + $0x348] sm:$0xff] %v1393_v8  ;;  %v1239_v10 = vpop.permute.xlu1 %1238  ;;  %v1251_v11 = vpop.permute.xlu0 %1250 }
 0x3cd   :  { %v1390_v53 = vmul.f32 %v1763_v24, %v1239_v10  ;;  %v1391_v23 = vmul.f32 %v1764_v36, %v1239_v10  ;;  %v1396_v31 = vmul.f32 %v1765_v37, %v1251_v11  ;;  %v1397_v32 = vmul.f32 %v1766_v9, %v1251_v11 }
 0x3cf   :  { %1518 = vst [vmem:[#allocation5 + $0x330] sm:$0xff] %v1390_v53  ;;  %1519 = vst [vmem:[#allocation5 + $0x338] sm:$0xff] %v1391_v23 }
 0x3d0   :  { %1524 = vst [vmem:[#allocation5 + $0x360] sm:$0xff] %v1396_v31  ;;  %1525 = vst [vmem:[#allocation5 + $0x368] sm:$0xff] %v1397_v32  ;;  %v1247_v55 = vpop.permute.xlu1 %1246  ;;  %v1259_v41 = vpop.permute.xlu0 %1258 }
 0x3d1   :  { %v1394_v19 = vmul.f32 %v1767_v54, %v1247_v55  ;;  %v1395_v26 = vmul.f32 %v1768_v60, %v1247_v55  ;;  %v1400_v33 = vmul.f32 %v1769_v17, %v1259_v41  ;;  %v1401_v16 = vmul.f32 %v1770_v25, %v1259_v41 }
 0x3d3   :  { %1522 = vst [vmem:[#allocation5 + $0x350] sm:$0xff] %v1394_v19  ;;  %1523 = vst [vmem:[#allocation5 + $0x358] sm:$0xff] %v1395_v26 }
 0x3d4   :  { %1528 = vst [vmem:[#allocation5 + $0x380] sm:$0xff] %v1400_v33  ;;  %1529 = vst [vmem:[#allocation5 + $0x388] sm:$0xff] %v1401_v16  ;;  %v1255_v21 = vpop.permute.xlu1 %1254  ;;  %v1267_v56 = vpop.permute.xlu0 %1266 }
 0x3d5   :  { %v1398_v35 = vmul.f32 %v1771_v30, %v1255_v21  ;;  %v1399_v42 = vmul.f32 %v1772_v3, %v1255_v21  ;;  %v1404_v27 = vmul.f32 %v1773_v29, %v1267_v56  ;;  %v1405_v34 = vmul.f32 %v1774_v57, %v1267_v56 }
 0x3d7   :  { %1526 = vst [vmem:[#allocation5 + $0x370] sm:$0xff] %v1398_v35  ;;  %1527 = vst [vmem:[#allocation5 + $0x378] sm:$0xff] %v1399_v42 }
 0x3d8   :  { %1532 = vst [vmem:[#allocation5 + $0x3a0] sm:$0xff] %v1404_v27  ;;  %1533 = vst [vmem:[#allocation5 + $0x3a8] sm:$0xff] %v1405_v34  ;;  %v1263_v12 = vpop.permute.xlu1 %1262  ;;  %v1275_v5 = vpop.permute.xlu0 %1274 }
 0x3d9   :  { %v1402_v22 = vmul.f32 %v1775_v43, %v1263_v12  ;;  %v1403_v38 = vmul.f32 %v1776_v4, %v1263_v12  ;;  %v1408_v63 = vmul.f32 %v1777_v40, %v1275_v5  ;;  %v1409_v44 = vmul.f32 %v1778_v58, %v1275_v5 }
 0x3db   :  { %1530 = vst [vmem:[#allocation5 + $0x390] sm:$0xff] %v1402_v22  ;;  %1531 = vst [vmem:[#allocation5 + $0x398] sm:$0xff] %v1403_v38 }
 0x3dc   :  { %1536 = vst [vmem:[#allocation5 + $0x3c0] sm:$0xff] %v1408_v63  ;;  %1537 = vst [vmem:[#allocation5 + $0x3c8] sm:$0xff] %v1409_v44  ;;  %v1271_v6 = vpop.permute.xlu1 %1270  ;;  %v1283_v15 = vpop.permute.xlu0 %1282 }
 0x3dd   :  { %v1406_v59 = vmul.f32 %v1779_v39, %v1271_v6  ;;  %v1407_v45 = vmul.f32 %v1780_v46, %v1271_v6  ;;  %v1412_v13 = vmul.f32 %v1781_v47, %v1283_v15  ;;  %v1413_v20 = vmul.f32 %v1782_v48, %v1283_v15 }
 0x3df   :  { %1534 = vst [vmem:[#allocation5 + $0x3b0] sm:$0xff] %v1406_v59  ;;  %1535 = vst [vmem:[#allocation5 + $0x3b8] sm:$0xff] %v1407_v45 }
 0x3e0   :  { %1540 = vst [vmem:[#allocation5 + $0x3e0] sm:$0xff] %v1412_v13  ;;  %1541 = vst [vmem:[#allocation5 + $0x3e8] sm:$0xff] %v1413_v20  ;;  %v1279_v49 = vpop.permute.xlu1 %1278 }
 0x3e1   :  { %v1410_v61 = vmul.f32 %v1783_v50, %v1279_v49  ;;  %v1411_v28 = vmul.f32 %v1784_v18, %v1279_v49 }
 0x3e3   :  { %1538 = vst [vmem:[#allocation5 + $0x3d0] sm:$0xff] %v1410_v61  ;;  %1539 = vst [vmem:[#allocation5 + $0x3d8] sm:$0xff] %v1411_v28 }
 0x3e4   :  { %v1287_v51 = vpop.permute.xlu1 %1286 }
 0x3e5   :  { %v1414_v62 = vmul.f32 %v1785_v52, %v1287_v51  ;;  %v1415_v0 = vmul.f32 %v1786_v14, %v1287_v51 }
 0x3e7   :  { %1542 = vst [vmem:[#allocation5 + $0x3f0] sm:$0xff] %v1414_v62  ;;  %1543 = vst [vmem:[#allocation5 + $0x3f8] sm:$0xff] %v1415_v0 }
 0x3e8   :  { %1820 = shalt.err (!%p1817_p12)
}
 0x3e9   :  { %s1821_s21 = scalar_lea.hbm %s2324_s5, 16384 }
 0x3ea   :  { %p1822_p13 = scmp.ne.s32.totalorder %s2324_s5, %s1821_s21  ;;  %p1825_p0 = scmp.lt.u32.totalorder %s1821_s21, %s2324_s5 }
 0x3ec   :  { %p1827_p1 = pnand %p1825_p0, %p1822_p13 }
 0x3ee   :  { %1830 = shalt.err (!%p1827_p1)
}
 0x3ef   :  { %1555 = dma.vmem_to_hbm [thread:$0]  %s1550_s3, 16384, %s2324_s5, [#allocation4], %s1836_s28, %s1836_s28, %s1837_s29  }
 0x3f0   :  { %1833 = dma.done.wait [#allocation4], 16384  }
 0x3f1   :  { %1834 = vsyncadd [#allocation4], 4294950912 }
 0x3f2   :  { %1559 = vsyncpa [#allocation3], 1 }
 0x3f3   :  { %1560 = vsyncpa [#allocation4], 1 }

</bundles_post_ra>
